<compile_context>
chip_gen: v5e
topology: v5e:2x2
jax: 0.10.0
libtpu: 0.0.40
codegen_flags: <defaults>
</compile_context>

<pallas_src>
import functools

import jax
import jax.numpy as jnp
from jax.experimental import pallas as pl
from jax.experimental.pallas import tpu as pltpu


def bottleneck_kernel(H, W, use_cat, x_ref, w1_ref, w2_ref, w3_ref,
                      b1_ref, b2_ref, b3_ref, o_ref):
    # x_ref:  (1, H*W, Cin)  f32 flattened NHWC activations
    # w1_ref: (Cin, P)       bf16, BN1 scale pre-folded
    # w2_ref: (3, 3P, P)     bf16 (use_cat)  or (3, 3, P, P) bf16 (9-dot path)
    # w3_ref: (P, Cout)      bf16, BN3 scale pre-folded
    # b*_ref: (1, C)         f32 folded BN biases
    P = w1_ref.shape[1]
    HW = H * W

    xm = x_ref[0]                                                    # (HW, Cin) f32

    # --- conv1 (1x1) + bn1 + relu -----------------------------------------
    o1 = jnp.dot(xm.astype(jnp.bfloat16), w1_ref[...],
                 preferred_element_type=jnp.float32)
    o1 = jnp.maximum(o1 + b1_ref[...], 0.0)                          # (HW, P) f32

    # --- conv2 (3x3, stride=1, pad=1) + bn2 + relu --------------------------
    # dx shifts built per-row with zero fill (no wrap, no mask needed),
    # then a zero H-halo row above/below.
    o1_3 = o1.reshape(H, W, P)
    zcol = jnp.zeros((H, 1, P), jnp.float32)
    zrow = jnp.zeros((1, W, P), jnp.float32)
    left3 = jnp.concatenate([zcol, o1_3[:, :W - 1, :]], axis=1)      # in[h, w-1]
    right3 = jnp.concatenate([o1_3[:, 1:, :], zcol], axis=1)         # in[h, w+1]

    def pad_h(a):                                                    # (H+2, W, P)
        return jnp.concatenate([zrow, a, zrow], axis=0)

    slabs = (pad_h(left3), pad_h(o1_3), pad_h(right3))               # dx = 0, 1, 2

    acc = jnp.zeros((HW, P), jnp.float32)
    if use_cat:
        # P < 128: concat dx along K -> 3 dots with K = 3P (better MXU fill).
        cat = jnp.concatenate(slabs, axis=-1)                        # (H+2, W, 3P)
        for dy in range(3):
            patch = cat[dy:dy + H].reshape(HW, 3 * P).astype(jnp.bfloat16)
            acc = acc + jnp.dot(patch, w2_ref[dy],
                                preferred_element_type=jnp.float32)
    else:
        # P >= 128: K fill already good; skip the 3x slab concat, do 9 dots.
        for dy in range(3):
            for dx in range(3):
                patch = slabs[dx][dy:dy + H].reshape(HW, P).astype(jnp.bfloat16)
                acc = acc + jnp.dot(patch, w2_ref[dy, dx],
                                    preferred_element_type=jnp.float32)
    o2 = jnp.maximum(acc + b2_ref[...], 0.0)                         # (HW, P) f32

    # --- conv3 (1x1) + bn3 + residual + relu --------------------------------
    o3 = jnp.dot(o2.astype(jnp.bfloat16), w3_ref[...],
                 preferred_element_type=jnp.float32) + b3_ref[...]
    o_ref[0] = jnp.maximum(o3 + xm, 0.0)                             # (HW, Cout)


def bottleneck_pallas(x_nchw, params):
    """x_nchw: (N, Cin, H, W) float32. Returns (N, Cin, H, W) float32."""
    w1, w2, w3, s1, b1, s2, b2, s3, b3 = params
    N, Cin, H, W = x_nchw.shape
    P = w1.shape[1]
    Cout = w3.shape[1]
    assert Cout == Cin, "stride=1 / downsample=None requires inplanes == planes*4"
    assert W % 8 == 0, "W must be a multiple of 8 for aligned sublane layout"
    HW = H * W
    use_cat = P < 128

    # Fold eval-mode BN scales into the conv weights, cast MXU operands to bf16.
    w1f = (w1 * s1).astype(jnp.bfloat16)                             # (Cin, P)
    w2f = w2 * s2.reshape(1, 1, 1, P)                                # (3,3,P,P) HWIO
    if use_cat:
        w2k = w2f.reshape(3, 3 * P, P).astype(jnp.bfloat16)          # dx cat on K
        w2_spec_shape = (3, 3 * P, P)
    else:
        w2k = w2f.astype(jnp.bfloat16)
        w2_spec_shape = (3, 3, P, P)
    w3f = (w3 * s3).astype(jnp.bfloat16)                             # (P, Cout)

    # NCHW -> flattened NHWC (N, H*W, C): lane-dense DMA / store layout.
    x_flat = jnp.transpose(x_nchw, (0, 2, 3, 1)).reshape(N, HW, Cin)

    # Generation-aware VMEM budget (~3/4 of physical VMEM per core).
    try:
        vmem_cap = int(pltpu.get_tpu_info().vmem_capacity_bytes)
    except Exception:
        vmem_cap = 64 * 1024 * 1024
    est = (
        2 * 4 * HW * (Cin + Cout)                      # x/out blocks, double-buffered
        + 2 * (Cin * P + 9 * P * P + P * Cout)         # bf16 weights (single-buffered)
        + 4 * (2 * P + Cout)                           # f32 biases
        + 4 * 4 * (H + 2) * W * P                      # padded dx slabs
        + 4 * (H + 2) * W * 3 * P                      # cat slab (f32, cat path)
        + (4 + 2) * HW * 3 * P                         # patch f32 + bf16 copy
        + 4 * HW * (3 * P + Cout)                      # o1 / acc / o2 / o3
    )
    vmem_limit = int(min(max(2 * est, 16 * 1024 * 1024), (vmem_cap * 3) // 4))

    def const_spec(shape):
        nd = len(shape)
        return pl.BlockSpec(shape, lambda *_: (0,) * nd,
                            pipeline_mode=pl.Buffered(1))

    out_flat = pl.pallas_call(
        functools.partial(bottleneck_kernel, H, W, use_cat),
        out_shape=jax.ShapeDtypeStruct((N, HW, Cout), jnp.float32),
        grid_spec=pltpu.PrefetchScalarGridSpec(
            num_scalar_prefetch=0,
            grid=(N,),
            in_specs=[
                pl.BlockSpec((1, HW, Cin), lambda n: (n, 0, 0)),     # x
                const_spec((Cin, P)),                                # w1 (bf16)
                const_spec(w2_spec_shape),                           # w2 (bf16)
                const_spec((P, Cout)),                               # w3 (bf16)
                const_spec((1, P)),                                  # b1
                const_spec((1, P)),                                  # b2
                const_spec((1, Cout)),                               # b3
            ],
            out_specs=pl.BlockSpec((1, HW, Cout), lambda n: (n, 0, 0)),
        ),
        compiler_params=pltpu.CompilerParams(
            dimension_semantics=("parallel",),
            vmem_limit_bytes=vmem_limit),
    )(x_flat, w1f, w2k, w3f, b1, b2, b3)

    return jnp.transpose(out_flat.reshape(N, H, W, Cout), (0, 3, 1, 2))


def bottleneck_reference(x_nchw, params):
    """Pure-JAX f32 reference (NHWC convs, eval-mode BN applied as scale/bias)."""
    w1, w2, w3, s1, b1, s2, b2, s3, b3 = params
    x = jnp.transpose(x_nchw, (0, 2, 3, 1))
    Cin = x.shape[-1]
    P = w1.shape[1]
    Cout = w3.shape[1]

    def conv(inp, w_hwio):
        return jax.lax.conv_general_dilated(
            inp, w_hwio, window_strides=(1, 1), padding="SAME",
            dimension_numbers=("NHWC", "HWIO", "NHWC"))

    o = conv(x, w1.reshape(1, 1, Cin, P))
    o = jnp.maximum(o * s1 + b1, 0.0)
    o = conv(o, w2)                               # (3,3,P,P) HWIO
    o = jnp.maximum(o * s2 + b2, 0.0)
    o = conv(o, w3.reshape(1, 1, P, Cout))
    o = o * s3 + b3
    o = jnp.maximum(o + x, 0.0)
    return jnp.transpose(o, (0, 3, 1, 2))


def make_params(key, inplanes, planes, expansion=4, eps=1e-5):
    """Deterministic synthetic weights + folded (eval-mode) batch-norm params."""
    cout = planes * expansion
    keys = jax.random.split(key, 12)

    def bn_fold(kg, kb, km, kv, c):
        gamma = 1.0 + 0.1 * jax.random.normal(kg, (c,), jnp.float32)
        beta = 0.1 * jax.random.normal(kb, (c,), jnp.float32)
        mean = 0.1 * jax.random.normal(km, (c,), jnp.float32)
        var = jnp.abs(jax.random.normal(kv, (c,), jnp.float32)) + 0.5
        scale = gamma * jax.lax.rsqrt(var + eps)
        bias = beta - mean * scale
        return scale.reshape(1, c), bias.reshape(1, c)

    w1 = 0.1 * jax.random.normal(keys[0], (inplanes, planes), jnp.float32)
    w2 = 0.1 * jax.random.normal(keys[1], (3, 3, planes, planes), jnp.float32)
    w3 = 0.1 * jax.random.normal(keys[2], (planes, cout), jnp.float32)
    s1, b1 = bn_fold(keys[3], keys[4], keys[5], keys[6], planes)
    s2, b2 = bn_fold(keys[7], keys[8], keys[9], keys[10], planes)
    s3, b3 = bn_fold(keys[11], keys[3], keys[7], keys[0], cout)
    return (w1, w2, w3, s1, b1, s2, b2, s3, b3)


if __name__ == "__main__":
    key = jax.random.PRNGKey(0)
    k_x, k_p = jax.random.split(key)

    N, inplanes, planes, H, W = 2, 16, 4, 16, 16   # inplanes == planes * 4
    x = jax.random.normal(k_x, (N, inplanes, H, W), jnp.float32)
    params = make_params(k_p, inplanes, planes)

    out = bottleneck_pallas(x, params)
    out = jax.block_until_ready(out)

    ref = bottleneck_reference(x, params)
    assert out.shape == ref.shape == (N, inplanes, H, W)
    # bf16 matmul operands -> relaxed tolerance vs. the f32 reference.
    assert jnp.allclose(out, ref, atol=3e-2, rtol=3e-2), (
        float(jnp.max(jnp.abs(out - ref))))

    print("KERNEL_OK")
</pallas_src>

<mosaic_0001>
module attributes {stable_mosaic.version = 11 : i64} {
  func.func @bottleneck_kernel(%arg0: i32, %arg1: memref<1x256x16xf32, #tpu.memory_space<vmem>>, %arg2: memref<16x4xbf16, #tpu.memory_space<vmem>>, %arg3: memref<3x12x4xbf16, #tpu.memory_space<vmem>>, %arg4: memref<4x16xbf16, #tpu.memory_space<vmem>>, %arg5: memref<1x4xf32, #tpu.memory_space<vmem>>, %arg6: memref<1x4xf32, #tpu.memory_space<vmem>>, %arg7: memref<1x16xf32, #tpu.memory_space<vmem>>, %arg8: memref<1x256x16xf32, #tpu.memory_space<vmem>>) attributes {dimension_semantics = [#tpu.dimension_semantics<parallel>], iteration_bounds = array<i64: 2>, scalar_prefetch = 0 : i64, scratch_operands = 0 : i64, tpu.core_type = #tpu.core_type<tc>, window_params = [{transform_indices = @transform_0, window_bounds = array<i64: 1, 256, 16>}, {pipeline_mode = #tpu.pipeline_mode<synchronous>, transform_indices = @transform_1, window_bounds = array<i64: 16, 4>}, {pipeline_mode = #tpu.pipeline_mode<synchronous>, transform_indices = @transform_2, window_bounds = array<i64: 3, 12, 4>}, {pipeline_mode = #tpu.pipeline_mode<synchronous>, transform_indices = @transform_3, window_bounds = array<i64: 4, 16>}, {pipeline_mode = #tpu.pipeline_mode<synchronous>, transform_indices = @transform_4, window_bounds = array<i64: 1, 4>}, {pipeline_mode = #tpu.pipeline_mode<synchronous>, transform_indices = @transform_5, window_bounds = array<i64: 1, 4>}, {pipeline_mode = #tpu.pipeline_mode<synchronous>, transform_indices = @transform_6, window_bounds = array<i64: 1, 16>}, {transform_indices = @transform_7, window_bounds = array<i64: 1, 256, 16>}]} {
    %c0 = arith.constant 0 : index
    %c0_0 = arith.constant 0 : index
    %c0_1 = arith.constant 0 : index
    %0 = vector.load %arg1[%c0, %c0_0, %c0_1] : memref<1x256x16xf32, #tpu.memory_space<vmem>>, vector<1x256x16xf32>
    %1 = vector.shape_cast %0 : vector<1x256x16xf32> to vector<256x16xf32>
    %2 = arith.truncf %1 : vector<256x16xf32> to vector<256x16xbf16>
    %c0_2 = arith.constant 0 : index
    %c0_3 = arith.constant 0 : index
    %3 = vector.load %arg2[%c0_2, %c0_3] : memref<16x4xbf16, #tpu.memory_space<vmem>>, vector<16x4xbf16>
    %cst = arith.constant dense<0.000000e+00> : vector<256x4xf32>
    %4 = tpu.matmul %2, %3, %cst {dimension_numbers = #tpu.dot_dimension_numbers<[1], [0], [0], [1], [0, 0, 1, 1], [], []>} : vector<256x16xbf16>, vector<16x4xbf16>, vector<256x4xf32> -> vector<256x4xf32>
    %c0_4 = arith.constant 0 : index
    %c0_5 = arith.constant 0 : index
    %5 = vector.load %arg5[%c0_4, %c0_5] : memref<1x4xf32, #tpu.memory_space<vmem>>, vector<1x4xf32>
    %6 = vector.broadcast %5 : vector<1x4xf32> to vector<256x4xf32>
    %7 = arith.addf %4, %6 : vector<256x4xf32>
    %cst_6 = arith.constant 0.000000e+00 : f32
    %8 = vector.broadcast %cst_6 : f32 to vector<256x4xf32>
    %9 = arith.maximumf %7, %8 : vector<256x4xf32>
    %10 = vector.shape_cast %9 : vector<256x4xf32> to vector<16x16x4xf32>
    %cst_7 = arith.constant 0.000000e+00 : f32
    %11 = vector.broadcast %cst_7 : f32 to vector<16x1x4xf32>
    %cst_8 = arith.constant 0.000000e+00 : f32
    %12 = vector.broadcast %cst_8 : f32 to vector<1x16x4xf32>
    %13 = vector.extract_strided_slice %10 {offsets = [0, 0, 0], sizes = [16, 15, 4], strides = [1, 1, 1]} : vector<16x16x4xf32> to vector<16x15x4xf32>
    %14 = tpu.concatenate %11, %13 in 1 : vector<16x1x4xf32>, vector<16x15x4xf32> -> vector<16x16x4xf32>
    %15 = vector.extract_strided_slice %10 {offsets = [0, 1, 0], sizes = [16, 15, 4], strides = [1, 1, 1]} : vector<16x16x4xf32> to vector<16x15x4xf32>
    %16 = tpu.concatenate %15, %11 in 1 : vector<16x15x4xf32>, vector<16x1x4xf32> -> vector<16x16x4xf32>
    %17 = tpu.concatenate %12, %14, %12 in 0 : vector<1x16x4xf32>, vector<16x16x4xf32>, vector<1x16x4xf32> -> vector<18x16x4xf32>
    %18 = tpu.concatenate %12, %10, %12 in 0 : vector<1x16x4xf32>, vector<16x16x4xf32>, vector<1x16x4xf32> -> vector<18x16x4xf32>
    %19 = tpu.concatenate %12, %16, %12 in 0 : vector<1x16x4xf32>, vector<16x16x4xf32>, vector<1x16x4xf32> -> vector<18x16x4xf32>
    %cst_9 = arith.constant 0.000000e+00 : f32
    %20 = vector.broadcast %cst_9 : f32 to vector<256x4xf32>
    %21 = tpu.concatenate %17, %18, %19 in 2 : vector<18x16x4xf32>, vector<18x16x4xf32>, vector<18x16x4xf32> -> vector<18x16x12xf32>
    %22 = vector.extract_strided_slice %21 {offsets = [0, 0, 0], sizes = [16, 16, 12], strides = [1, 1, 1]} : vector<18x16x12xf32> to vector<16x16x12xf32>
    %23 = vector.shape_cast %22 : vector<16x16x12xf32> to vector<256x12xf32>
    %24 = arith.truncf %23 : vector<256x12xf32> to vector<256x12xbf16>
    %c0_10 = arith.constant 0 : index
    %c0_11 = arith.constant 0 : index
    %c0_12 = arith.constant 0 : index
    %25 = vector.load %arg3[%c0_10, %c0_11, %c0_12] : memref<3x12x4xbf16, #tpu.memory_space<vmem>>, vector<1x12x4xbf16>
    %26 = vector.shape_cast %25 : vector<1x12x4xbf16> to vector<12x4xbf16>
    %cst_13 = arith.constant dense<0.000000e+00> : vector<256x4xf32>
    %27 = tpu.matmul %24, %26, %cst_13 {dimension_numbers = #tpu.dot_dimension_numbers<[1], [0], [0], [1], [0, 0, 1, 1], [], []>} : vector<256x12xbf16>, vector<12x4xbf16>, vector<256x4xf32> -> vector<256x4xf32>
    %28 = arith.addf %20, %27 : vector<256x4xf32>
    %29 = vector.extract_strided_slice %21 {offsets = [1, 0, 0], sizes = [16, 16, 12], strides = [1, 1, 1]} : vector<18x16x12xf32> to vector<16x16x12xf32>
    %30 = vector.shape_cast %29 : vector<16x16x12xf32> to vector<256x12xf32>
    %31 = arith.truncf %30 : vector<256x12xf32> to vector<256x12xbf16>
    %c1 = arith.constant 1 : index
    %c0_14 = arith.constant 0 : index
    %c0_15 = arith.constant 0 : index
    %32 = vector.load %arg3[%c1, %c0_14, %c0_15] : memref<3x12x4xbf16, #tpu.memory_space<vmem>>, vector<1x12x4xbf16>
    %33 = vector.shape_cast %32 : vector<1x12x4xbf16> to vector<12x4xbf16>
    %cst_16 = arith.constant dense<0.000000e+00> : vector<256x4xf32>
    %34 = tpu.matmul %31, %33, %cst_16 {dimension_numbers = #tpu.dot_dimension_numbers<[1], [0], [0], [1], [0, 0, 1, 1], [], []>} : vector<256x12xbf16>, vector<12x4xbf16>, vector<256x4xf32> -> vector<256x4xf32>
    %35 = arith.addf %28, %34 : vector<256x4xf32>
    %36 = vector.extract_strided_slice %21 {offsets = [2, 0, 0], sizes = [16, 16, 12], strides = [1, 1, 1]} : vector<18x16x12xf32> to vector<16x16x12xf32>
    %37 = vector.shape_cast %36 : vector<16x16x12xf32> to vector<256x12xf32>
    %38 = arith.truncf %37 : vector<256x12xf32> to vector<256x12xbf16>
    %c2 = arith.constant 2 : index
    %c0_17 = arith.constant 0 : index
    %c0_18 = arith.constant 0 : index
    %39 = vector.load %arg3[%c2, %c0_17, %c0_18] : memref<3x12x4xbf16, #tpu.memory_space<vmem>>, vector<1x12x4xbf16>
    %40 = vector.shape_cast %39 : vector<1x12x4xbf16> to vector<12x4xbf16>
    %cst_19 = arith.constant dense<0.000000e+00> : vector<256x4xf32>
    %41 = tpu.matmul %38, %40, %cst_19 {dimension_numbers = #tpu.dot_dimension_numbers<[1], [0], [0], [1], [0, 0, 1, 1], [], []>} : vector<256x12xbf16>, vector<12x4xbf16>, vector<256x4xf32> -> vector<256x4xf32>
    %42 = arith.addf %35, %41 : vector<256x4xf32>
    %c0_20 = arith.constant 0 : index
    %c0_21 = arith.constant 0 : index
    %43 = vector.load %arg6[%c0_20, %c0_21] : memref<1x4xf32, #tpu.memory_space<vmem>>, vector<1x4xf32>
    %44 = vector.broadcast %43 : vector<1x4xf32> to vector<256x4xf32>
    %45 = arith.addf %42, %44 : vector<256x4xf32>
    %cst_22 = arith.constant 0.000000e+00 : f32
    %46 = vector.broadcast %cst_22 : f32 to vector<256x4xf32>
    %47 = arith.maximumf %45, %46 : vector<256x4xf32>
    %48 = arith.truncf %47 : vector<256x4xf32> to vector<256x4xbf16>
    %c0_23 = arith.constant 0 : index
    %c0_24 = arith.constant 0 : index
    %49 = vector.load %arg4[%c0_23, %c0_24] : memref<4x16xbf16, #tpu.memory_space<vmem>>, vector<4x16xbf16>
    %cst_25 = arith.constant dense<0.000000e+00> : vector<256x16xf32>
    %50 = tpu.matmul %48, %49, %cst_25 {dimension_numbers = #tpu.dot_dimension_numbers<[1], [0], [0], [1], [0, 0, 1, 1], [], []>} : vector<256x4xbf16>, vector<4x16xbf16>, vector<256x16xf32> -> vector<256x16xf32>
    %c0_26 = arith.constant 0 : index
    %c0_27 = arith.constant 0 : index
    %51 = vector.load %arg7[%c0_26, %c0_27] : memref<1x16xf32, #tpu.memory_space<vmem>>, vector<1x16xf32>
    %52 = vector.broadcast %51 : vector<1x16xf32> to vector<256x16xf32>
    %53 = arith.addf %50, %52 : vector<256x16xf32>
    %54 = arith.addf %53, %1 : vector<256x16xf32>
    %cst_28 = arith.constant 0.000000e+00 : f32
    %55 = vector.broadcast %cst_28 : f32 to vector<256x16xf32>
    %56 = arith.maximumf %54, %55 : vector<256x16xf32>
    %c0_29 = arith.constant 0 : index
    %c0_30 = arith.constant 0 : index
    %c0_31 = arith.constant 0 : index
    %57 = vector.load %arg8[%c0_29, %c0_30, %c0_31] : memref<1x256x16xf32, #tpu.memory_space<vmem>>, vector<1x256x16xf32>
    %58 = vector.shape_cast %57 : vector<1x256x16xf32> to vector<256x16xf32>
    %59 = vector.shape_cast %56 : vector<256x16xf32> to vector<1x256x16xf32>
    tpu.vector_store %arg8[%c0_29, %c0_30, %c0_31], %59 {strides = array<i32>} : memref<1x256x16xf32, #tpu.memory_space<vmem>>, vector<1x256x16xf32>,
    return
  }
  func.func @transform_0(%arg0: i32) -> (i32, i32, i32) {
    %c0_i32 = arith.constant 0 : i32
    %c0_i32_0 = arith.constant 0 : i32
    %c0_i32_1 = arith.constant 0 : i32
    return %arg0, %c0_i32, %c0_i32_0 : i32, i32, i32
  }
  func.func @transform_1(%arg0: i32) -> (i32, i32) {
    %c0_i32 = arith.constant 0 : i32
    %c0_i32_0 = arith.constant 0 : i32
    %c0_i32_1 = arith.constant 0 : i32
    return %c0_i32, %c0_i32_0 : i32, i32
  }
  func.func @transform_2(%arg0: i32) -> (i32, i32, i32) {
    %c0_i32 = arith.constant 0 : i32
    %c0_i32_0 = arith.constant 0 : i32
    %c0_i32_1 = arith.constant 0 : i32
    %c0_i32_2 = arith.constant 0 : i32
    return %c0_i32, %c0_i32_0, %c0_i32_1 : i32, i32, i32
  }
  func.func @transform_3(%arg0: i32) -> (i32, i32) {
    %c0_i32 = arith.constant 0 : i32
    %c0_i32_0 = arith.constant 0 : i32
    %c0_i32_1 = arith.constant 0 : i32
    return %c0_i32, %c0_i32_0 : i32, i32
  }
  func.func @transform_4(%arg0: i32) -> (i32, i32) {
    %c0_i32 = arith.constant 0 : i32
    %c0_i32_0 = arith.constant 0 : i32
    %c0_i32_1 = arith.constant 0 : i32
    return %c0_i32, %c0_i32_0 : i32, i32
  }
  func.func @transform_5(%arg0: i32) -> (i32, i32) {
    %c0_i32 = arith.constant 0 : i32
    %c0_i32_0 = arith.constant 0 : i32
    %c0_i32_1 = arith.constant 0 : i32
    return %c0_i32, %c0_i32_0 : i32, i32
  }
  func.func @transform_6(%arg0: i32) -> (i32, i32) {
    %c0_i32 = arith.constant 0 : i32
    %c0_i32_0 = arith.constant 0 : i32
    %c0_i32_1 = arith.constant 0 : i32
    return %c0_i32, %c0_i32_0 : i32, i32
  }
  func.func @transform_7(%arg0: i32) -> (i32, i32, i32) {
    %c0_i32 = arith.constant 0 : i32
    %c0_i32_0 = arith.constant 0 : i32
    %c0_i32_1 = arith.constant 0 : i32
    return %arg0, %c0_i32, %c0_i32_0 : i32, i32, i32
  }
}

</mosaic_0001>

<bundles_post_ra>
// kernel: tpu_custom_call.1
= control target key start
LH: loop header
LB: loop body
LE: loop exit
PB: predicated region body
PF: predicated region fallthrough
CT: control target
= control target key end

     0   :  { %s2162_s24 = smov 0   ;;  %s3056_s0 = inlined_call_operand.vmem [shape: f32[2,256,16], index: 0, kind: input, shape index: {}]   ;;  %s3057_s1 = inlined_call_operand.vmem [shape: bf16[16,4], index: 1, kind: input, shape index: {}]   ;;  %s3058_s2 = inlined_call_operand.vmem [shape: bf16[3,12,4], index: 2, kind: input, shape index: {}]   ;;  %s3059_s3 = inlined_call_operand.vmem [shape: bf16[4,16], index: 3, kind: input, shape index: {}]   ;;  %s3060_s4 = inlined_call_operand.vmem [shape: f32[1,4], index: 4, kind: input, shape index: {}]   ;;  %s3061_s5 = inlined_call_operand.vmem [shape: f32[1,4], index: 5, kind: input, shape index: {}]   ;;  %s3062_s6 = inlined_call_operand.vmem [shape: f32[1,16], index: 6, kind: input, shape index: {}]   ;;  %s3063_s7 = inlined_call_operand.vmem [shape: f32[2,256,16], index: 7, kind: output, shape index: {}]  }
   0x1 LB: > { %s1785_s25 = sadd.s32 4294967295, %s2117_s24   ;;  %p1789_p0 = scmp.ge.s32.totalorder %s2117_s24, 1  ;;  %s2117_s24 = sphi %s2162_s24, %s17_s24  }
   0x2   : > { %p237_p1 = scmp.lt.s32.totalorder %s2117_s24, 3 }
   0x4   : > { %p238_p2 = pnand %p1789_p0, %p237_p1 }
   0x5   : > { %p269_p3 = scmp.lt.s32.totalorder (!%p238_p2), %s1785_s25, 1  ;;  %s2119_s11 = smov (!%p238_p2), 4  }
   0x6   : > { %241 = sbr.rel (%p238_p2) target bundleno = 831 (0x33f), region = 48  ;;  %s2120_s12 = smov (!%p238_p2), 8  }
   0xb   : > { %v1898_v0 = vld [vmem:[%s3057_s1] sm:$0xff]  ;;  %s3065_s25 = smov (!%p269_p3, %s1785_s25), 1  ;;  %vm340_vm0 = vcmask 130048   ;;  %vm542_vm1 = vcmask 1040384   ;;  %vm639_vm2 = vcmask 1046528   ;;  %vm1079_vm3 = vcmask 1045504  }
   0xc   : > { %396 = vmatpush.bf16.msra.mxu0 %v1898_v0  ;;  %1902 = vmatpush.bf16.msra.mxu1 %v1898_v0  ;;  %s1896_s28 = sshll.u32 %s3065_s25, 8  ;;  %v2234_v50 = vld [vmem:[%s3060_s4] ss:$0 sm:$0xff]  ;;  %vm935_vm4 = vcmask 31744   ;;  %vm969_vm5 = vcmask 64512   ;;  %vm1030_vm6 = vcmask 97280  }
   0xd   : > { %1903 = vmatpush.bf16.msra.mxu2 %v1898_v0  ;;  %1904 = vmatpush.bf16.msra.mxu3 %v1898_v0  ;;  %s2181_s8 = scalar_lea.vmem %s3056_s0, %s1896_s28  ;;  %vm1541_vm7 = vcmask 1041408   ;;  %s2903_s14 = scalar_lea.vmem %s3063_s7, %s1896_s28 }
   0xe   : > { %v280_v1 = vld [vmem:[%s2181_s8] sm:$0xff]  ;;  %v281_v2 = vld [vmem:[%s2181_s8 + $0x8] sm:$0xff]  ;;  %v282_v10 = vld [vmem:[%s2181_s8 + $0x10] sm:$0xff] }
   0xf   : > { %v288_v3 = vld [vmem:[%s2181_s8 + $0x40] sm:$0xff]  ;;  %v312_v4 = vpack.c.bf16 %v281_v2, %v280_v1  ;;  %v289_v5 = vld [vmem:[%s2181_s8 + $0x48] sm:$0xff]  ;;  %v283_v11 = vld [vmem:[%s2181_s8 + $0x18] sm:$0xff] }
  0x10   : > { %v316_v6 = vpack.c.bf16 %v289_v5, %v288_v3  ;;  %v296_v7 = vld [vmem:[%s2181_s8 + $0x80] sm:$0xff]  ;;  %v297_v8 = vld [vmem:[%s2181_s8 + $0x88] sm:$0xff]  ;;  %v290_v12 = vld [vmem:[%s2181_s8 + $0x50] sm:$0xff]  ;;  %v313_v16 = vpack.c.bf16 %v283_v11, %v282_v10  ;;  %v2121_v5 = vmov 0.0  }
  0x11   : > { %1798 = vmatmul.msk.bf16.vlgmr.msra.gmra.mxu0 %vm340_vm0, %v312_v4  ;;  %v320_v9 = vpack.c.bf16 %v297_v8, %v296_v7  ;;  %v291_v13 = vld [vmem:[%s2181_s8 + $0x58] sm:$0xff]  ;;  %v298_v14 = vld [vmem:[%s2181_s8 + $0x90] sm:$0xff]  ;;  %v304_v19 = vld [vmem:[%s2181_s8 + $0xc0] sm:$0xff] }
  0x12   : > { %1802 = vmatmul.msk.bf16.vlgmr.msra.gmra.mxu1 %vm340_vm0, %v316_v6  ;;  %v299_v15 = vld [vmem:[%s2181_s8 + $0x98] sm:$0xff]  ;;  %v317_v17 = vpack.c.bf16 %v291_v13, %v290_v12  ;;  %v305_v20 = vld [vmem:[%s2181_s8 + $0xc8] sm:$0xff]  ;;  %v284_v22 = vld [vmem:[%s2181_s8 + $0x20] sm:$0xff] }
  0x13   : > { %1806 = vmatmul.msk.bf16.vlgmr.msra.gmra.mxu2 %vm340_vm0, %v320_v9  ;;  %v321_v18 = vpack.c.bf16 %v299_v15, %v298_v14  ;;  %v324_v21 = vpack.c.bf16 %v305_v20, %v304_v19  ;;  %v285_v23 = vld [vmem:[%s2181_s8 + $0x28] sm:$0xff]  ;;  %v292_v24 = vld [vmem:[%s2181_s8 + $0x60] sm:$0xff]  ;;  %v306_v30 = vld [vmem:[%s2181_s8 + $0xd0] sm:$0xff] }
  0x14   : > { %v293_v25 = vld [vmem:[%s2181_s8 + $0x68] sm:$0xff]  ;;  %v300_v26 = vld [vmem:[%s2181_s8 + $0xa0] sm:$0xff]  ;;  %v314_v28 = vpack.c.bf16 %v285_v23, %v284_v22  ;;  %v307_v31 = vld [vmem:[%s2181_s8 + $0xd8] sm:$0xff] }
  0x15   : > { %1810 = vmatmul.msk.bf16.vlgmr.msra.gmra.mxu3 %vm340_vm0, %v324_v21  ;;  %v301_v27 = vld [vmem:[%s2181_s8 + $0xa8] sm:$0xff]  ;;  %v318_v29 = vpack.c.bf16 %v293_v25, %v292_v24  ;;  %v325_v33 = vpack.c.bf16 %v307_v31, %v306_v30  ;;  %v286_v34 = vld [vmem:[%s2181_s8 + $0x30] sm:$0xff]  ;;  %v287_v35 = vld [vmem:[%s2181_s8 + $0x38] sm:$0xff] }
  0x16   : > { %v322_v32 = vpack.c.bf16 %v301_v27, %v300_v26  ;;  %v294_v36 = vld [vmem:[%s2181_s8 + $0x70] sm:$0xff]  ;;  %v295_v37 = vld [vmem:[%s2181_s8 + $0x78] sm:$0xff]  ;;  %v315_v40 = vpack.c.bf16 %v287_v35, %v286_v34  ;;  %v308_v42 = vld [vmem:[%s2181_s8 + $0xe0] sm:$0xff] }
  0x17   : > { %v302_v38 = vld [vmem:[%s2181_s8 + $0xb0] sm:$0xff]  ;;  %v303_v39 = vld [vmem:[%s2181_s8 + $0xb8] sm:$0xff]  ;;  %v319_v41 = vpack.c.bf16 %v295_v37, %v294_v36  ;;  %v309_v43 = vld [vmem:[%s2181_s8 + $0xe8] sm:$0xff] }
  0x18   : > { %v323_v44 = vpack.c.bf16 %v303_v39, %v302_v38  ;;  %v326_v45 = vpack.c.bf16 %v309_v43, %v308_v42  ;;  %v310_v46 = vld [vmem:[%s2181_s8 + $0xf0] sm:$0xff]  ;;  %v311_v47 = vld [vmem:[%s2181_s8 + $0xf8] sm:$0xff] }
  0x19   : > { %v327_v48 = vpack.c.bf16 %v311_v47, %v310_v46 }
  0x21   : > { %1799 = vmatmul.msk.bf16.gmra.mxu0 %vm340_vm0, %v313_v16 }
  0x22   : > { %1803 = vmatmul.msk.bf16.gmra.mxu1 %vm340_vm0, %v317_v17 }
  0x23   : > { %1807 = vmatmul.msk.bf16.gmra.mxu2 %vm340_vm0, %v321_v18 }
  0x25   : > { %1811 = vmatmul.msk.bf16.gmra.mxu3 %vm340_vm0, %v325_v33 }
  0x31   : > { %1800 = vmatmul.msk.bf16.gmra.mxu0 %vm340_vm0, %v314_v28 }
  0x32   : > { %1804 = vmatmul.msk.bf16.gmra.mxu1 %vm340_vm0, %v318_v29 }
  0x33   : > { %1808 = vmatmul.msk.bf16.gmra.mxu2 %vm340_vm0, %v322_v32 }
  0x35   : > { %1812 = vmatmul.msk.bf16.gmra.mxu3 %vm340_vm0, %v326_v45 }
  0x41   : > { %1801 = vmatmul.msk.bf16.gmra.mxu0 %vm340_vm0, %v315_v40 }
  0x42   : > { %1805 = vmatmul.msk.bf16.gmra.mxu1 %vm340_vm0, %v319_v41 }
  0x43   : > { %1809 = vmatmul.msk.bf16.gmra.mxu2 %vm340_vm0, %v323_v44 }
  0x45   : > { %1813 = vmatmul.msk.bf16.gmra.mxu3 %vm340_vm0, %v327_v48 }
  0x8e   : > { %v398_v49 = vpop.f32.mrf.mxu0 }
  0x8f   : > { %v418_v51 = vpop.f32.mrf.mxu1  ;;  %v399_v52 = vadd.f32 %v2234_v50, %v398_v49 }
  0x90   : > { %v419_v33 = vadd.f32 %v2234_v50, %v418_v51 }
  0x91   : > { %v2239_v55 = vmax.f32 %v399_v52, 0.0 }
  0x92   : > { %v2292_v41 = vmax.f32 %v419_v33, 0.0 }
  0x93   : > { %v543_v59 = vrot.slane %v2239_v55, 7  ;;  %v640_v22 = vrot.slane %v2239_v55, 1 }
  0x94   : > { %v555_v47 = vrot.slane %v2292_v41, 7 }
  0x96   : > { %v400_v53 = vpop.f32.mrf.mxu0  ;;  %v2237_v54 = vpop.f32.mrf.mxu2 }
  0x97   : > { %v401_v56 = vadd.f32 %v2234_v50, %v400_v53  ;;  %v420_v57 = vpop.f32.mrf.mxu1 }
  0x98   : > { %v2280_v28 = vpop.f32.mrf.mxu3  ;;  %v421_v34 = vadd.f32 %v2234_v50, %v420_v57 }
  0x99   : > { %v479_v58 = vmax.f32 %v401_v56, 0.0 }
  0x9a   : > { %v487_v42 = vmax.f32 %v421_v34, 0.0 }
  0x9b   : > { %v544_v60 = vrot.slane %v479_v58, 7  ;;  %725 = vrot.lane.b32.xlu2 %v479_v58, %s2119_s11  ;;  %v641_v63 = vrot.slane %v479_v58, 1 }
  0x9c   : > { %v556_v48 = vrot.slane %v487_v42, 7 }
  0x9d   : > { %v2247_v61 = vsel %vm542_vm1, %v543_v59, %v544_v60  ;;  %v704_v4 = vsel %vm639_vm2, %v641_v63, 0.0  ;;  %v642_v24 = vsel %vm639_vm2, %v640_v22, %v641_v63 }
  0x9e   : > { %v403_v62 = vpop.f32.mrf.mxu0  ;;  %v2249_v0 = vpop.f32.mrf.mxu2 }
  0x9f   : > { %v404_v1 = vadd.f32 %v2234_v50, %v403_v62  ;;  %v423_v2 = vpop.f32.mrf.mxu1  ;;  %v2316_v62 = vsel %vm542_vm1, %v555_v47, %v556_v48 }
  0xa0   : > { %v424_v36 = vadd.f32 %v2234_v50, %v423_v2  ;;  %v2301_v53 = vpop.f32.mrf.mxu3 }
  0xa1   : > { %v2252_v3 = vmax.f32 %v404_v1, 0.0 }
  0xa2   : > { %v2303_v56 = vmax.f32 %v424_v36, 0.0 }
  0xa3   : > { %840 = vrot.lane.b32.xlu2 %v704_v4, %s2120_s12  ;;  %v1916_v6 = vpack.i.bf16 %v2252_v3, %v2121_v5  ;;  %v546_v12 = vrot.slane %v2252_v3, 7  ;;  %v643_v13 = vrot.slane %v2252_v3, 1  ;;  %v1956_v4 = vpack.i.bf16 %v487_v42, %v2292_v41 }
  0xa4   : > { %v655_v63 = vrot.slane %v2303_v56, 1 }
  0xa5   : > { %1917 = vrot.lane.b32.xlu0 %v1916_v6, %s2119_s11 }
  0xa6   : > { %v405_v7 = vpop.f32.mrf.mxu0  ;;  %v2259_v10 = vpop.f32.mrf.mxu2 }
  0xa7   : > { %v406_v8 = vadd.f32 %v2234_v50, %v405_v7  ;;  %v425_v9 = vpop.f32.mrf.mxu1 }
  0xa8   : > { %v426_v38 = vadd.f32 %v2234_v50, %v425_v9 }
  0xa9   : > { %v481_v11 = vmax.f32 %v406_v8, 0.0 }
  0xaa   : > { %v2305_v57 = vmax.f32 %v426_v38, 0.0 }
  0xab   : > { %v547_v14 = vrot.slane %v481_v11, 7  ;;  %v644_v15 = vrot.slane %v481_v11, 1  ;;  %v1926_v16 = vpack.i.bf16 %v2239_v55, %v481_v11 }
  0xac   : > { %v656_v1 = vrot.slane %v2305_v57, 1 }
  0xad   : > { %1927 = vrot.lane.b32.xlu1 %v1926_v16, %s2119_s11  ;;  %v645_v17 = vsel %vm639_vm2, %v643_v13, %v644_v15  ;;  %v2269_v18 = vsel %vm542_vm1, %v546_v12, %v547_v14  ;;  %v705_v23 = vsel %vm639_vm2, %v644_v15, 0.0  ;;  %v652_v13 = vrot.slane %v2292_v41, 1  ;;  %v2331_v14 = vpop.f32.mrf.mxu3  ;;  %v1838_v15 = vld [vmem:[%s3058_s2] sm:$0xf]  ;;  %v1899_v16 = vld [vmem:[%s3058_s2] sm:$0x30] }
  0xae   : > { %v408_v19 = vpop.f32.mrf.mxu0  ;;  %v1921_v20 = vpack.i.bf16 %v645_v17, %v2121_v5  ;;  %v2277_v25 = vpop.f32.mrf.mxu2  ;;  %v1931_v27 = vpack.i.bf16 %v642_v24, %v705_v23  ;;  %v657_v9 = vsel %vm639_vm2, %v655_v63, %v656_v1  ;;  %v709_v11 = vsel %vm639_vm2, %v656_v1, 0.0  ;;  %v1860_v24 = vld [vmem:[%s3058_s2 + $0x10] sm:$0xf] }
  0xaf   : > { %v2271_v21 = vpop.f32.mrf.mxu1  ;;  %v409_v26 = vadd.f32 %v2234_v50, %v408_v19  ;;  %v653_v17 = vrot.slane %v487_v42, 1  ;;  %v439_v19 = vadd.f32 %v2234_v50, %v2237_v54  ;;  %v1839_v23 = vor.u32 %v1899_v16, %v1838_v15 }
  0xb0   : > { %1922 = vrot.lane.b32.xlu0 %v1921_v20, %s2120_s12  ;;  %v429_v36 = vadd.f32 %v2234_v50, %v2271_v21 }
  0xb1   : > { %v2283_v30 = vmax.f32 %v409_v26, 0.0  ;;  %v1901_v26 = vld [vmem:[%s3058_s2 + $0x10] sm:$0x30]  ;;  %v654_v21 = vsel %vm639_vm2, %v652_v13, %v653_v17 }
  0xb3   : > { %v646_v37 = vrot.slane %v2283_v30, 1  ;;  %v549_v49 = vrot.slane %v2283_v30, 7 }
  0xb5   : > { %1932 = vrot.lane.b32.xlu1 %v1931_v27, %s2120_s12  ;;  %v558_v27 = vrot.slane %v2303_v56, 7  ;;  %v2389_v15 = vpop.f32.mrf.mxu3 }
  0xb6   : > { %v410_v29 = vpop.f32.mrf.mxu0  ;;  %v2294_v44 = vpop.f32.mrf.mxu2 }
  0xb7   : > { %v411_v31 = vadd.f32 %v2234_v50, %v410_v29  ;;  %v430_v32 = vpop.f32.mrf.mxu1  ;;  %v441_v29 = vadd.f32 %v2234_v50, %v2249_v0 }
  0xb9   : > { %v483_v35 = vmax.f32 %v411_v31, 0.0  ;;  %v1971_v31 = vpack.i.bf16 %v709_v11, %v657_v9  ;;  %v1900_v11 = vld [vmem:[%s3058_s2 + $0x8] sm:$0x30] }
  0xbb   : > { %v647_v39 = vrot.slane %v483_v35, 1  ;;  %v1936_v40 = vpack.i.bf16 %v483_v35, %v2283_v30  ;;  %v550_v43 = vrot.slane %v483_v35, 7  ;;  %v1861_v35 = vor.u32 %v1901_v26, %v1860_v24 }
  0xbd   : > { %1937 = vrot.lane.b32.xlu0 %v1936_v40, %s2119_s11  ;;  %v648_v45 = vsel %vm639_vm2, %v646_v37, %v647_v39  ;;  %v706_v46 = vsel %vm639_vm2, %v647_v39, 0.0  ;;  %v2311_v60 = vsel %vm542_vm1, %v549_v49, %v550_v43  ;;  %v431_v37 = vadd.f32 %v2234_v50, %v430_v32 }
  0xbe   : > { %v413_v51 = vpop.f32.mrf.mxu0  ;;  %v1941_v52 = vpack.i.bf16 %v706_v46, %v648_v45  ;;  %v2322_v6 = vpop.f32.mrf.mxu2  ;;  %v1181_v43 = vsel %vm1079_vm3, %v1839_v23, 0  ;;  %v559_v45 = vrot.slane %v2305_v57, 7  ;;  %v708_v32 = vsel %vm639_vm2, %v653_v17, 0.0 }
  0xbf   : > { %v433_v58 = vpop.f32.mrf.mxu1  ;;  %v414_v2 = vadd.f32 %v2234_v50, %v413_v51  ;;  %1190 = vmatpush.bf16.msrb.mxu2 %v1181_v43  ;;  %v1281_v51 = vsel %vm1079_vm3, %v1861_v35, 0  ;;  %v1961_v9 = vpack.i.bf16 %v708_v32, %v654_v21  ;;  %v446_v21 = vadd.f32 %v2234_v50, %v2277_v25 }
  0xc0   : > { %1942 = vrot.lane.b32.xlu1 %v1941_v52, %s2120_s12  ;;  %v434_v38 = vadd.f32 %v2234_v50, %v433_v58  ;;  %v2366_v52 = vmax.f32 %v439_v19, 0.0  ;;  %v2368_v58 = vmax.f32 %v441_v29, 0.0  ;;  %1290 = vmatpush.bf16.msrb.mxu3 %v1281_v51  ;;  %v2394_v17 = vsel %vm542_vm1, %v558_v27, %v559_v45 }
  0xc1   : > { %v2324_v7 = vmax.f32 %v414_v2, 0.0  ;;  %v1966_v19 = vpack.i.bf16 %v2305_v57, %v2303_v56 }
  0xc2   : > { %v2370_v63 = vmax.f32 %v434_v38, 0.0  ;;  %v664_v23 = vrot.slane %v2366_v52, 1  ;;  %v665_v24 = vrot.slane %v2368_v58, 1 }
  0xc3   : > { %v649_v54 = vrot.slane %v2324_v7, 1  ;;  %v552_v48 = vrot.slane %v2324_v7, 7 }
  0xc6   : > { %v415_v5 = vpop.f32.mrf.mxu0  ;;  %v453_v2 = vpop.f32.mrf.mxu2 }
  0xc7   : > { %v416_v8 = vadd.f32 %v2234_v50, %v415_v5  ;;  %v435_v22 = vpop.f32.mrf.mxu1  ;;  %v2379_v5 = vmax.f32 %v429_v36, 0.0  ;;  %v454_v32 = vadd.f32 %v2234_v50, %v453_v2  ;;  %v2441_v2 = vmax.f32 %v446_v21, 0.0 }
  0xc8   : > { %1957 = vrot.lane.b32.xlu1 %v1956_v4, %s2119_s11  ;;  %v436_v39 = vadd.f32 %v2234_v50, %v435_v22  ;;  %v1818_v4 = vld [vmem:[%s3058_s2 + $0x8] sm:$0xf]  ;;  %v461_v21 = vadd.f32 %v2234_v50, %v2301_v53 }
  0xc9   : > { %v485_v20 = vmax.f32 %v416_v8, 0.0  ;;  %v491_v8 = vmax.f32 %v431_v37, 0.0  ;;  %v1819_v16 = vor.u32 %v1900_v11, %v1818_v4  ;;  %v658_v26 = vrot.slane %v2379_v5, 1 }
  0xca   : > { %v2374_v1 = vmax.f32 %v436_v39, 0.0  ;;  %v561_v35 = vrot.slane %v2379_v5, 7  ;;  %v661_v37 = vrot.slane %v2370_v63, 1 }
  0xcb   : > { %v650_v33 = vrot.slane %v485_v20, 1  ;;  %v1946_v34 = vpack.i.bf16 %v485_v20, %v2324_v7  ;;  %v553_v40 = vrot.slane %v485_v20, 7  ;;  %v1081_v22 = vsel %vm1079_vm3, %v1819_v16, 0 }
  0xcc   : > { %v1986_v20 = vpack.i.bf16 %v2374_v1, %v2370_v63  ;;  %v659_v29 = vrot.slane %v491_v8, 1  ;;  %1090 = vmatpush.bf16.msrb.mxu1 %v1081_v22  ;;  %v1976_v57 = vpack.i.bf16 %v491_v8, %v2379_v5  ;;  %v562_v36 = vrot.slane %v491_v8, 7 }
  0xcd   : > { %1947 = vrot.lane.b32.xlu2 %v1946_v34, %s2119_s11  ;;  %v651_v0 = vsel %vm639_vm2, %v649_v54, %v650_v33  ;;  %v707_v42 = vsel %vm639_vm2, %v650_v33, 0.0  ;;  %v2387_v13 = vsel %vm542_vm1, %v552_v48, %v553_v40  ;;  %v666_v33 = vsel %vm639_vm2, %v664_v23, %v665_v24 }
  0xce   : > { %v1951_v46 = vpack.i.bf16 %v707_v42, %v651_v0  ;;  %v710_v54 = vsel %vm639_vm2, %v659_v29, 0.0  ;;  %v712_v34 = vsel %vm639_vm2, %v665_v24, 0.0  ;;  %v662_v38 = vrot.slane %v2374_v1, 1  ;;  %v455_v39 = vpop.f32.mrf.mxu2 }
  0xcf   : > { %v444_v40 = vadd.f32 %v2234_v50, %v2259_v10  ;;  %v449_v0 = vadd.f32 %v2234_v50, %v2294_v44  ;;  %v451_v42 = vadd.f32 %v2234_v50, %v2322_v6  ;;  %v2001_v45 = vpack.i.bf16 %v712_v34, %v666_v33 }
  0xd0   : > { %1952 = vrot.lane.b32.xlu0 %v1951_v46, %s2120_s12  ;;  %1972 = vrot.lane.b32.xlu1 %v1971_v31, %s2120_s12  ;;  %v660_v31 = vsel %vm639_vm2, %v658_v26, %v659_v29  ;;  %v468_v46 = vpop.f32.mrf.mxu3  ;;  %v456_v51 = vadd.f32 %v2234_v50, %v455_v39  ;;  %v663_v10 = vsel %vm639_vm2, %v661_v37, %v662_v38  ;;  %v711_v4 = vsel %vm639_vm2, %v662_v38, 0.0 }
  0xd1   : > { %v1981_v43 = vpack.i.bf16 %v710_v54, %v660_v31  ;;  %v2431_v44 = vsel %vm542_vm1, %v561_v35, %v562_v36  ;;  %v2433_v6 = vmax.f32 %v444_v40, 0.0  ;;  %v2435_v8 = vmax.f32 %v449_v0, 0.0 }
  0xd2   : > { %v2437_v25 = vmax.f32 %v451_v42, 0.0  ;;  %v1991_v11 = vpack.i.bf16 %v711_v4, %v663_v10  ;;  %v2445_v16 = vmax.f32 %v456_v51, 0.0  ;;  %v668_v23 = vrot.slane %v2441_v2, 1 }
  0xd3   : > { %v667_v22 = vrot.slane %v2433_v6, 1  ;;  %v670_v36 = vrot.slane %v2435_v8, 1  ;;  %v564_v38 = vrot.slane %v2370_v63, 7  ;;  %v459_v39 = vadd.f32 %v2234_v50, %v2280_v28 }
  0xd4   : > { %v674_v26 = vrot.slane %v2445_v16, 1  ;;  %v713_v54 = vsel %vm639_vm2, %v668_v23, 0.0  ;;  %v671_v37 = vrot.slane %v2437_v25, 1  ;;  %v464_v40 = vadd.f32 %v2234_v50, %v2331_v14 }
  0xd5   : > { %1962 = vrot.lane.b32.xlu2 %v1961_v9, %s2120_s12  ;;  %v2443_v9 = vmax.f32 %v454_v32, 0.0  ;;  %v669_v31 = vsel %vm639_vm2, %v667_v22, %v668_v23  ;;  %v565_v0 = vrot.slane %v2374_v1, 7  ;;  %v466_v42 = vadd.f32 %v2234_v50, %v2389_v15 }
  0xd6   : > { %v715_v34 = vsel %vm639_vm2, %v674_v26, 0.0  ;;  %v469_v32 = vadd.f32 %v2234_v50, %v468_v46  ;;  %v672_v28 = vsel %vm639_vm2, %v670_v36, %v671_v37  ;;  %v714_v14 = vsel %vm639_vm2, %v671_v37, 0.0 }
  0xd7   : > { %v673_v24 = vrot.slane %v2443_v9, 1  ;;  %v2481_v10 = vmax.f32 %v459_v39, 0.0  ;;  %v2483_v1 = vmax.f32 %v464_v40, 0.0  ;;  %v2485_v15 = vmax.f32 %v466_v42, 0.0 }
  0xd8   : > { %1967 = vrot.lane.b32.xlu0 %v1966_v19, %s2119_s11  ;;  %1987 = vrot.lane.b32.xlu1 %v1986_v20, %s2119_s11  ;;  %v1996_v19 = vpack.i.bf16 %v2368_v58, %v2366_v52  ;;  %v2016_v20 = vpack.i.bf16 %v2437_v25, %v2435_v8  ;;  %v470_v29 = vpop.f32.mrf.mxu3  ;;  %v2492_v46 = vsel %vm542_vm1, %v564_v38, %v565_v0  ;;  %v2494_v4 = vmax.f32 %v461_v21, 0.0 }
  0xd9   : > { %v675_v33 = vsel %vm639_vm2, %v673_v24, %v674_v26  ;;  %v471_v51 = vadd.f32 %v2234_v50, %v470_v29  ;;  %v2026_v22 = vpack.i.bf16 %v2445_v16, %v2443_v9  ;;  %v2046_v23 = vpack.i.bf16 %v2485_v15, %v2483_v1 }
  0xda   : > { %v676_v24 = vrot.slane %v2481_v10, 1  ;;  %v677_v26 = vrot.slane %v2494_v4, 1  ;;  %v567_v37 = vrot.slane %v2366_v52, 7  ;;  %v568_v39 = vrot.slane %v2368_v58, 7 }
  0xdb   : > { %v679_v40 = vrot.slane %v2483_v1, 1  ;;  %v680_v0 = vrot.slane %v2485_v15, 1  ;;  %v583_v7 = vrot.slane %v2485_v15, 7  ;;  %v630_v15 = vsel %vm542_vm1, 0.0, %v564_v38 }
  0xdc   : > { %v2529_v58 = vsel %vm542_vm1, %v567_v37, %v568_v39  ;;  %v574_v39 = vrot.slane %v2437_v25, 7 }
  0xdd   : > { %1977 = vrot.lane.b32.xlu2 %v1976_v57, %s2119_s11  ;;  %v2006_v57 = vpack.i.bf16 %v2441_v2, %v2433_v6 }
  0xe0   : > { %1982 = vrot.lane.b32.xlu0 %v1981_v43, %s2120_s12  ;;  %2002 = vrot.lane.b32.xlu1 %v2001_v45, %s2120_s12  ;;  %v2011_v43 = vpack.i.bf16 %v713_v54, %v669_v31  ;;  %v2031_v45 = vpack.i.bf16 %v715_v34, %v675_v33  ;;  %v473_v53 = vpop.f32.mrf.mxu3  ;;  %v2036_v31 = vpack.i.bf16 %v2494_v4, %v2481_v10  ;;  %v716_v33 = vsel %vm639_vm2, %v677_v26, 0.0 }
  0xe1   : > { %v678_v54 = vsel %vm639_vm2, %v676_v24, %v677_v26  ;;  %v474_v21 = vadd.f32 %v2234_v50, %v473_v53 }
  0xe5   : > { %1992 = vrot.lane.b32.xlu2 %v1991_v11, %s2120_s12  ;;  %v2496_v11 = vmax.f32 %v469_v32, 0.0 }
  0xe7   : > { %v682_v29 = vrot.slane %v2496_v11, 1 }
  0xe8   : > { %1997 = vrot.lane.b32.xlu0 %v1996_v19, %s2119_s11  ;;  %2017 = vrot.lane.b32.xlu1 %v2016_v20, %s2119_s11  ;;  %v2021_v19 = vpack.i.bf16 %v714_v14, %v672_v28  ;;  %v2498_v20 = vmax.f32 %v471_v51, 0.0  ;;  %v475_v42 = vpop.f32.mrf.mxu3  ;;  %v681_v51 = vsel %vm639_vm2, %v679_v40, %v680_v0  ;;  %v717_v28 = vsel %vm639_vm2, %v680_v0, 0.0 }
  0xe9   : > { %v476_v32 = vadd.f32 %v2234_v50, %v475_v42  ;;  %v2533_v14 = vmax.f32 %v474_v21, 0.0  ;;  %v2051_v53 = vpack.i.bf16 %v717_v28, %v681_v51 }
  0xea   : > { %v2056_v50 = vpack.i.bf16 %v2498_v20, %v2496_v11 }
  0xed   : > { %2007 = vrot.lane.b32.xlu2 %v2006_v57, %s2119_s11  ;;  %v683_v57 = vrot.slane %v2498_v20, 1 }
  0xef   : > { %v684_v34 = vsel %vm639_vm2, %v682_v29, %v683_v57  ;;  %v718_v36 = vsel %vm639_vm2, %v683_v57, 0.0  ;;  %v570_v29 = vrot.slane %v2433_v6, 7  ;;  %v571_v57 = vrot.slane %v2441_v2, 7 }
  0xf0   : > { %2012 = vrot.lane.b32.xlu0 %v2011_v43, %s2120_s12  ;;  %2032 = vrot.lane.b32.xlu1 %v2031_v45, %s2120_s12  ;;  %v2041_v43 = vpack.i.bf16 %v716_v33, %v678_v54  ;;  %v2061_v45 = vpack.i.bf16 %v718_v36, %v684_v34  ;;  %v573_v36 = vrot.slane %v2435_v8, 7 }
  0xf1   : > { %v2552_v33 = vsel %vm542_vm1, %v570_v29, %v571_v57 }
  0xf2   : > { %v2561_v2 = vsel %vm542_vm1, %v573_v36, %v574_v39 }
  0xf5   : > { %2022 = vrot.lane.b32.xlu2 %v2021_v19, %s2120_s12  ;;  %v2535_v19 = vmax.f32 %v476_v32, 0.0  ;;  %v726_v34 = vpop.permute.xlu2 %725 }
  0xf6   : > { %v938_v55 = vsel %vm935_vm4, %v2247_v61, %v726_v34  ;;  %v580_v34 = vrot.slane %v2494_v4, 7 }
  0xf7   : > { %v2066_v54 = vpack.i.bf16 %v2535_v19, %v2533_v14 }
  0xf8   : > { %2027 = vrot.lane.b32.xlu0 %v2026_v22, %s2119_s11  ;;  %2047 = vrot.lane.b32.xlu1 %v2046_v23, %s2119_s11  ;;  %v685_v22 = vrot.slane %v2533_v14, 1  ;;  %v686_v23 = vrot.slane %v2535_v19, 1 }
  0xfa   : > { %v687_v24 = vsel %vm639_vm2, %v685_v22, %v686_v23  ;;  %v719_v26 = vsel %vm639_vm2, %v686_v23, 0.0  ;;  %v623_v23 = vsel %vm542_vm1, 0.0, %v543_v59 }
  0xfd   : > { %2037 = vrot.lane.b32.xlu2 %v2036_v31, %s2119_s11  ;;  %v2071_v31 = vpack.i.bf16 %v719_v26, %v687_v24  ;;  %v841_v0 = vpop.permute.xlu2 %840  ;;  %v624_v24 = vsel %vm542_vm1, 0.0, %v546_v12 }
 0x100   : > { %2042 = vrot.lane.b32.xlu0 %v2041_v43, %s2120_s12  ;;  %2062 = vrot.lane.b32.xlu1 %v2061_v45, %s2120_s12 }
 0x105   : > { %2052 = vrot.lane.b32.xlu2 %v2051_v53, %s2120_s12 }
 0x108   : > { %2057 = vrot.lane.b32.xlu0 %v2056_v50, %s2119_s11 }
 0x10d   : > { %2067 = vrot.lane.b32.xlu2 %v2066_v54, %s2119_s11  ;;  %v577_v54 = vrot.slane %v2445_v16, 7 }
 0x110   : > { %2072 = vrot.lane.b32.xlu0 %v2071_v31, %s2120_s12  ;;  %v576_v31 = vrot.slane %v2443_v9, 7 }
 0x112   : > { %v2592_v61 = vsel %vm542_vm1, %v576_v31, %v577_v54 }
 0x117   : > { %v1918_v40 = vpop.permute.xlu0 %1917 }
 0x118   : > { %v1919_v43 = vunpack.i.l.bf16 %v1918_v40  ;;  %v1920_v51 = vunpack.i.h.bf16 %v1918_v40 }
 0x11a   : > { %v936_v32 = vsel %vm935_vm4, 0.0, %v1919_v43  ;;  %v939_v59 = vsel %vm935_vm4, %v624_v24, %v1920_v51 }
 0x11f   : > { %v1928_v42 = vpop.permute.xlu1 %1927 }
 0x120   : > { %v1930_v28 = vunpack.i.h.bf16 %v1928_v42  ;;  %v1929_v53 = vunpack.i.l.bf16 %v1928_v42  ;;  %v972_v42 = vsel %vm969_vm5, %v938_v55, %v841_v0 }
 0x122   : > { %v1923_v45 = vpop.permute.xlu0 %1922  ;;  %v937_v3 = vsel %vm935_vm4, %v623_v23, %v1930_v28  ;;  %v940_v12 = vsel %vm935_vm4, %v2269_v18, %v1929_v53  ;;  %v579_v18 = vrot.slane %v2481_v10, 7 }
 0x123   : > { %v1924_v21 = vunpack.i.l.bf16 %v1923_v45  ;;  %v1925_v50 = vunpack.i.h.bf16 %v1923_v45 }
 0x125   : > { %v970_v25 = vsel %vm969_vm5, %v936_v32, %v1924_v21  ;;  %v973_v43 = vsel %vm969_vm5, %v939_v59, %v1925_v50  ;;  %v625_v50 = vsel %vm542_vm1, 0.0, %v549_v49 }
 0x126   : > { %v2565_v22 = vpack.c.bf16 %v970_v25, %v970_v25 }
 0x127   : > { %v1948_v26 = vpop.permute.xlu2 %1947  ;;  %v1933_v57 = vpop.permute.xlu1 %1932 }
 0x128   : > { %v1935_v39 = vunpack.i.h.bf16 %v1933_v57  ;;  %v1934_v40 = vunpack.i.l.bf16 %v1933_v57  ;;  %1840 = vmatmul.msk.bf16.vlgmr.msrb.gmra.mxu2 %vm1030_vm6, %v2565_v22  ;;  %v2602_v57 = vsel %vm542_vm1, %v579_v18, %v580_v34  ;;  %v1950_v41 = vunpack.i.h.bf16 %v1948_v26 }
 0x12a   : > { %v971_v16 = vsel %vm969_vm5, %v937_v3, %v1935_v39  ;;  %v974_v45 = vsel %vm969_vm5, %v940_v12, %v1934_v40  ;;  %v627_v12 = vsel %vm542_vm1, 0.0, %v555_v47  ;;  %v1949_v47 = vunpack.i.l.bf16 %v1948_v26 }
 0x12b   : > { %v1004_v21 = vpack.c.bf16 %v972_v42, %v971_v16  ;;  %v1005_v32 = vpack.c.bf16 %v974_v45, %v973_v43  ;;  %v582_v26 = vrot.slane %v2483_v1, 7 }
 0x12d   : > { %1820 = vmatmul.msk.bf16.vlgmr.msrb.gmra.mxu1 %vm1030_vm6, %v1004_v21  ;;  %1862 = vmatmul.msk.bf16.vlgmr.msrb.gmra.mxu3 %vm1030_vm6, %v1005_v32  ;;  %v2661_v56 = vsel %vm542_vm1, %v582_v26, %v583_v7 }
 0x12f   : > { %v1938_v0 = vpop.permute.xlu0 %1937  ;;  %v1963_v51 = vpop.permute.xlu2 %1962 }
 0x130   : > { %v1940_v28 = vunpack.i.h.bf16 %v1938_v0  ;;  %v1939_v53 = vunpack.i.l.bf16 %v1938_v0  ;;  %v1964_v42 = vunpack.i.l.bf16 %v1963_v51 }
 0x132   : > { %v1943_v25 = vpop.permute.xlu1 %1942  ;;  %v942_v54 = vsel %vm935_vm4, %v2311_v60, %v1940_v28  ;;  %v941_v4 = vsel %vm935_vm4, %v625_v50, %v1939_v53  ;;  %v1965_v60 = vunpack.i.h.bf16 %v1963_v51  ;;  %v944_v50 = vsel %vm935_vm4, %v2387_v13, %v1950_v41 }
 0x133   : > { %v1945_v23 = vunpack.i.h.bf16 %v1943_v25  ;;  %v1944_v24 = vunpack.i.l.bf16 %v1943_v25 }
 0x135   : > { %v975_v39 = vsel %vm969_vm5, %v941_v4, %v1944_v24  ;;  %v976_v40 = vsel %vm969_vm5, %v942_v54, %v1945_v23 }
 0x136   : > { %v2609_v55 = vpack.c.bf16 %v976_v40, %v975_v39 }
 0x137   : > { %v2611_v30 = vpop.permute.xlu2 %1977 }
 0x138   : > { %1841 = vmatmul.msk.bf16.gmra.mxu2 %vm1030_vm6, %v1004_v21 }
 0x13a   : > { %v1958_v49 = vpop.permute.xlu1 %1957 }
 0x13b   : > { %v1960_v59 = vunpack.i.h.bf16 %v1958_v49  ;;  %v1959_v3 = vunpack.i.l.bf16 %v1958_v49 }
 0x13d   : > { %v946_v43 = vsel %vm935_vm4, %v2316_v62, %v1960_v59  ;;  %v945_v16 = vsel %vm935_vm4, %v627_v12, %v1959_v3  ;;  %1821 = vmatmul.msk.bf16.gmra.mxu1 %vm1030_vm6, %v1005_v32  ;;  %1863 = vmatmul.msk.bf16.gmra.mxu3 %vm1030_vm6, %v2609_v55  ;;  %v626_v62 = vsel %vm542_vm1, 0.0, %v552_v48 }
 0x13e   : > { %v979_v45 = vsel %vm969_vm5, %v945_v16, %v1964_v42  ;;  %v980_v21 = vsel %vm969_vm5, %v946_v43, %v1965_v60  ;;  %v943_v23 = vsel %vm935_vm4, %v626_v62, %v1949_v47  ;;  %v1980_v47 = vunpack.i.h.bf16 %v2611_v30 }
 0x13f   : > { %v2625_v34 = vpack.c.bf16 %v980_v21, %v979_v45  ;;  %v1993_v0 = vpop.permute.xlu2 %1992 }
 0x140   : > { %v1995_v48 = vunpack.i.h.bf16 %v1993_v0  ;;  %v1994_v39 = vunpack.i.l.bf16 %v1993_v0  ;;  %v1979_v0 = vunpack.i.l.bf16 %v2611_v30 }
 0x142   : > { %v1953_v51 = vpop.permute.xlu0 %1952  ;;  %v1973_v28 = vpop.permute.xlu1 %1972 }
 0x143   : > { %v1955_v53 = vunpack.i.h.bf16 %v1953_v51  ;;  %v1954_v25 = vunpack.i.l.bf16 %v1953_v51  ;;  %v1975_v40 = vunpack.i.h.bf16 %v1973_v28  ;;  %v1974_v49 = vunpack.i.l.bf16 %v1973_v28 }
 0x145   : > { %v977_v24 = vsel %vm969_vm5, %v943_v23, %v1954_v25  ;;  %v978_v54 = vsel %vm969_vm5, %v944_v50, %v1955_v53  ;;  %v629_v53 = vsel %vm542_vm1, 0.0, %v561_v35  ;;  %v585_v23 = vrot.slane %v2496_v11, 7 }
 0x146   : > { %v2635_v4 = vpack.c.bf16 %v978_v54, %v977_v24  ;;  %v586_v24 = vrot.slane %v2498_v20, 7  ;;  %v950_v54 = vsel %vm935_vm4, %v2431_v44, %v1980_v47  ;;  %v949_v7 = vsel %vm935_vm4, %v629_v53, %v1979_v0 }
 0x147   : > { %v2640_v3 = vpop.permute.xlu2 %2007  ;;  %v588_v35 = vrot.slane %v2533_v14, 7  ;;  %v589_v44 = vrot.slane %v2535_v19, 7  ;;  %v632_v53 = vsel %vm542_vm1, 0.0, %v570_v29 }
 0x148   : > { %1842 = vmatmul.msk.bf16.gmra.mxu2 %vm1030_vm6, %v1005_v32  ;;  %v628_v32 = vsel %vm542_vm1, 0.0, %v558_v27  ;;  %v2690_v5 = vsel %vm542_vm1, %v585_v23, %v586_v24 }
 0x14a   : > { %v1968_v59 = vpop.permute.xlu0 %1967  ;;  %v1988_v13 = vpop.permute.xlu1 %1987 }
 0x14b   : > { %v1970_v12 = vunpack.i.h.bf16 %v1968_v59  ;;  %v1969_v60 = vunpack.i.l.bf16 %v1968_v59  ;;  %v1990_v42 = vunpack.i.h.bf16 %v1988_v13  ;;  %v1989_v43 = vunpack.i.l.bf16 %v1988_v13 }
 0x14d   : > { %v948_v16 = vsel %vm935_vm4, %v2394_v17, %v1970_v12  ;;  %v947_v45 = vsel %vm935_vm4, %v628_v32, %v1969_v60  ;;  %v952_v21 = vsel %vm935_vm4, %v2492_v46, %v1990_v42  ;;  %v951_v41 = vsel %vm935_vm4, %v630_v15, %v1989_v43  ;;  %1822 = vmatmul.msk.bf16.gmra.mxu1 %vm1030_vm6, %v2609_v55 }
 0x14e   : > { %1864 = vmatmul.msk.bf16.gmra.mxu3 %vm1030_vm6, %v2635_v4  ;;  %v981_v27 = vsel %vm969_vm5, %v947_v45, %v1974_v49  ;;  %v982_v63 = vsel %vm969_vm5, %v948_v16, %v1975_v40  ;;  %v985_v17 = vsel %vm969_vm5, %v951_v41, %v1994_v39  ;;  %v986_v46 = vsel %vm969_vm5, %v952_v21, %v1995_v48 }
 0x14f   : > { %v2666_v38 = vpack.c.bf16 %v982_v63, %v981_v27  ;;  %v2671_v51 = vpack.c.bf16 %v986_v46, %v985_v17  ;;  %v2023_v30 = vpop.permute.xlu2 %2022  ;;  %v633_v16 = vsel %vm542_vm1, 0.0, %v573_v36  ;;  %v2720_v27 = vsel %vm542_vm1, %v588_v35, %v589_v44 }
 0x150   : > { %v2025_v20 = vunpack.i.h.bf16 %v2023_v30  ;;  %v2024_v49 = vunpack.i.l.bf16 %v2023_v30  ;;  %v2010_v17 = vunpack.i.h.bf16 %v2640_v3  ;;  %v2009_v46 = vunpack.i.l.bf16 %v2640_v3 }
 0x152   : > { %v1983_v28 = vpop.permute.xlu0 %1982  ;;  %v2003_v62 = vpop.permute.xlu1 %2002  ;;  %v956_v24 = vsel %vm935_vm4, %v2552_v33, %v2010_v17 }
 0x153   : > { %v1985_v25 = vunpack.i.h.bf16 %v1983_v28  ;;  %v1984_v50 = vunpack.i.l.bf16 %v1983_v28  ;;  %v2005_v59 = vunpack.i.h.bf16 %v2003_v62  ;;  %v2004_v13 = vunpack.i.l.bf16 %v2003_v62 }
 0x155   : > { %v983_v48 = vsel %vm969_vm5, %v949_v7, %v1984_v50  ;;  %v984_v39 = vsel %vm969_vm5, %v950_v54, %v1985_v25  ;;  %v955_v54 = vsel %vm935_vm4, %v632_v53, %v2009_v46 }
 0x156   : > { %v2683_v40 = vpack.c.bf16 %v984_v39, %v983_v48 }
 0x157   : > { %v2038_v36 = vpop.permute.xlu2 %2037 }
 0x158   : > { %1843 = vmatmul.msk.bf16.gmra.mxu2 %vm1030_vm6, %v2609_v55  ;;  %v631_v55 = vsel %vm542_vm1, 0.0, %v567_v37 }
 0x15a   : > { %v1998_v12 = vpop.permute.xlu0 %1997  ;;  %v2018_v60 = vpop.permute.xlu1 %2017 }
 0x15b   : > { %v2000_v42 = vunpack.i.h.bf16 %v1998_v12  ;;  %v1999_v43 = vunpack.i.l.bf16 %v1998_v12  ;;  %v2020_v32 = vunpack.i.h.bf16 %v2018_v60  ;;  %v2019_v15 = vunpack.i.l.bf16 %v2018_v60 }
 0x15c   : > { %v634_v60 = vsel %vm542_vm1, 0.0, %v576_v31 }
 0x15d   : > { %v954_v19 = vsel %vm935_vm4, %v2529_v58, %v2000_v42  ;;  %v953_v45 = vsel %vm935_vm4, %v631_v55, %v1999_v43  ;;  %v958_v21 = vsel %vm935_vm4, %v2561_v2, %v2020_v32  ;;  %v957_v41 = vsel %vm935_vm4, %v633_v16, %v2019_v15  ;;  %1823 = vmatmul.msk.bf16.gmra.mxu1 %vm1030_vm6, %v2635_v4  ;;  %v1488_v2 = vld [vmem:[%s3059_s3] sm:$0x3] }
 0x15e   : > { %1865 = vmatmul.msk.bf16.gmra.mxu3 %vm1030_vm6, %v2625_v34  ;;  %v987_v52 = vsel %vm969_vm5, %v953_v45, %v2004_v13  ;;  %v988_v8 = vsel %vm969_vm5, %v954_v19, %v2005_v59  ;;  %v991_v37 = vsel %vm969_vm5, %v957_v41, %v2024_v49  ;;  %v992_v58 = vsel %vm969_vm5, %v958_v21, %v2025_v20 }
 0x15f   : > { %v2722_v63 = vpack.c.bf16 %v988_v8, %v987_v52  ;;  %v1543_v47 = vsel %vm1541_vm7, %v1488_v2, 0  ;;  %v2726_v0 = vpack.c.bf16 %v992_v58, %v991_v37  ;;  %v2053_v48 = vpop.permute.xlu2 %2052  ;;  %v636_v42 = vsel %vm542_vm1, 0.0, %v582_v26 }
 0x160   : > { %1552 = vmatpush.bf16.msrb.mxu0 %v1543_v47  ;;  %v2055_v20 = vunpack.i.h.bf16 %v2053_v48  ;;  %v2054_v49 = vunpack.i.l.bf16 %v2053_v48  ;;  %v2039_v16 = vunpack.i.l.bf16 %v2038_v36  ;;  %v635_v19 = vsel %vm542_vm1, 0.0, %v579_v18 }
 0x162   : > { %v2013_v28 = vpop.permute.xlu0 %2012  ;;  %v2033_v62 = vpop.permute.xlu1 %2032  ;;  %v961_v8 = vsel %vm935_vm4, %v635_v19, %v2039_v16 }
 0x163   : > { %v2015_v25 = vunpack.i.h.bf16 %v2013_v28  ;;  %v2014_v50 = vunpack.i.l.bf16 %v2013_v28  ;;  %v2035_v6 = vunpack.i.h.bf16 %v2033_v62  ;;  %v2034_v39 = vunpack.i.l.bf16 %v2033_v62 }
 0x165   : > { %v989_v7 = vsel %vm969_vm5, %v955_v54, %v2014_v50  ;;  %v990_v3 = vsel %vm969_vm5, %v956_v24, %v2015_v25 }
 0x166   : > { %v2736_v30 = vpack.c.bf16 %v990_v3, %v989_v7 }
 0x167   : > { %v2068_v28 = vpop.permute.xlu2 %2067 }
 0x168   : > { %1844 = vmatmul.msk.bf16.gmra.mxu2 %vm1030_vm6, %v2635_v4  ;;  %v2070_v50 = vunpack.i.h.bf16 %v2068_v28  ;;  %v2069_v24 = vunpack.i.l.bf16 %v2068_v28 }
 0x16a   : > { %v2028_v29 = vpop.permute.xlu0 %2027  ;;  %v2048_v44 = vpop.permute.xlu1 %2047 }
 0x16b   : > { %v2030_v59 = vunpack.i.h.bf16 %v2028_v29  ;;  %v2029_v33 = vunpack.i.l.bf16 %v2028_v29  ;;  %v2050_v13 = vunpack.i.h.bf16 %v2048_v44  ;;  %v2049_v12 = vunpack.i.l.bf16 %v2048_v44 }
 0x16d   : > { %v960_v4 = vsel %vm935_vm4, %v2592_v61, %v2030_v59  ;;  %v959_v43 = vsel %vm935_vm4, %v634_v60, %v2029_v33  ;;  %v964_v32 = vsel %vm935_vm4, %v2661_v56, %v2050_v13  ;;  %v963_v15 = vsel %vm935_vm4, %v636_v42, %v2049_v12  ;;  %1824 = vmatmul.msk.bf16.gmra.mxu1 %vm1030_vm6, %v2625_v34 }
 0x16e   : > { %v997_v9 = vsel %vm969_vm5, %v963_v15, %v2054_v49  ;;  %v998_v31 = vsel %vm969_vm5, %v964_v32, %v2055_v20  ;;  %1866 = vmatmul.msk.bf16.gmra.mxu3 %vm1030_vm6, %v2666_v38  ;;  %v993_v1 = vsel %vm969_vm5, %v959_v43, %v2034_v39  ;;  %v994_v61 = vsel %vm969_vm5, %v960_v4, %v2035_v6  ;;  %v2821_v49 = vld [vmem:[%s3061_s5] ss:$0 sm:$0xff] }
 0x16f   : > { %v2760_v26 = vpack.c.bf16 %v998_v31, %v997_v9  ;;  %v2762_v55 = vpack.c.bf16 %v994_v61, %v993_v1  ;;  %v2040_v56 = vunpack.i.h.bf16 %v2038_v36 }
 0x171   : > { %v962_v52 = vsel %vm935_vm4, %v2602_v57, %v2040_v56  ;;  %v637_v57 = vsel %vm542_vm1, 0.0, %v585_v23  ;;  %v638_v23 = vsel %vm542_vm1, 0.0, %v588_v35 }
 0x172   : > { %v2043_v45 = vpop.permute.xlu0 %2042  ;;  %v2063_v17 = vpop.permute.xlu1 %2062  ;;  %v967_v54 = vsel %vm935_vm4, %v638_v23, %v2069_v24 }
 0x173   : > { %v2045_v21 = vunpack.i.h.bf16 %v2043_v45  ;;  %v2044_v41 = vunpack.i.l.bf16 %v2043_v45  ;;  %v2065_v18 = vunpack.i.h.bf16 %v2063_v17  ;;  %v2064_v36 = vunpack.i.l.bf16 %v2063_v17 }
 0x175   : > { %v995_v37 = vsel %vm969_vm5, %v961_v8, %v2044_v41  ;;  %v996_v58 = vsel %vm969_vm5, %v962_v52, %v2045_v21 }
 0x176   : > { %v2772_v2 = vpack.c.bf16 %v996_v58, %v995_v37 }
 0x178   : > { %1845 = vmatmul.msk.bf16.gmra.mxu2 %vm1030_vm6, %v2625_v34 }
 0x17a   : > { %v2058_v10 = vpop.permute.xlu0 %2057 }
 0x17b   : > { %v2060_v46 = vunpack.i.h.bf16 %v2058_v10  ;;  %v2059_v47 = vunpack.i.l.bf16 %v2058_v10 }
 0x17d   : > { %v966_v62 = vsel %vm935_vm4, %v2690_v5, %v2060_v46  ;;  %v965_v53 = vsel %vm935_vm4, %v637_v57, %v2059_v47  ;;  %1825 = vmatmul.msk.bf16.gmra.mxu1 %vm1030_vm6, %v2666_v38  ;;  %v968_v5 = vsel %vm935_vm4, %v2720_v27, %v2070_v50 }
 0x17e   : > { %v1000_v34 = vsel %vm969_vm5, %v966_v62, %v2065_v18  ;;  %v999_v25 = vsel %vm969_vm5, %v965_v53, %v2064_v36  ;;  %1867 = vmatmul.msk.bf16.gmra.mxu3 %vm1030_vm6, %v2683_v40 }
 0x17f   : > { %v2788_v11 = vpack.c.bf16 %v1000_v34, %v999_v25 }
 0x182   : > { %v2073_v7 = vpop.permute.xlu0 %2072 }
 0x183   : > { %v2075_v3 = vunpack.i.h.bf16 %v2073_v7  ;;  %v2074_v48 = vunpack.i.l.bf16 %v2073_v7 }
 0x185   : > { %v1001_v6 = vsel %vm969_vm5, %v967_v54, %v2074_v48  ;;  %v1002_v39 = vsel %vm969_vm5, %v968_v5, %v2075_v3 }
 0x186   : > { %v2798_v29 = vpack.c.bf16 %v1002_v39, %v1001_v6 }
 0x188   : > { %1846 = vmatmul.msk.bf16.gmra.mxu2 %vm1030_vm6, %v2666_v38 }
 0x18d   : > { %1826 = vmatmul.msk.bf16.gmra.mxu1 %vm1030_vm6, %v2683_v40 }
 0x18e   : > { %1868 = vmatmul.msk.bf16.gmra.mxu3 %vm1030_vm6, %v2671_v51 }
 0x198   : > { %1847 = vmatmul.msk.bf16.gmra.mxu2 %vm1030_vm6, %v2683_v40 }
 0x19d   : > { %1827 = vmatmul.msk.bf16.gmra.mxu1 %vm1030_vm6, %v2671_v51 }
 0x19e   : > { %1869 = vmatmul.msk.bf16.gmra.mxu3 %vm1030_vm6, %v2722_v63 }
 0x1a8   : > { %1848 = vmatmul.msk.bf16.gmra.mxu2 %vm1030_vm6, %v2671_v51 }
 0x1aa   : > { %v1092_v14 = vpop.f32.mrf.mxu1 }
 0x1ab   : > { %v1192_v38 = vpop.f32.mrf.mxu2 }
 0x1ac   : > { %v1193_v40 = vadd.f32 %v1192_v38, %v1092_v14 }
 0x1ad   : > { %1828 = vmatmul.msk.bf16.gmra.mxu1 %vm1030_vm6, %v2722_v63 }
 0x1ae   : > { %1870 = vmatmul.msk.bf16.gmra.mxu3 %vm1030_vm6, %v2736_v30 }
 0x1b0   : > { %v1292_v35 = vpop.f32.mrf.mxu3 }
 0x1b1   : > { %v1372_v20 = vadd.f32 %v1292_v35, %v1193_v40 }
 0x1b2   : > { %v1094_v27 = vpop.f32.mrf.mxu1 }
 0x1b3   : > { %v1194_v44 = vpop.f32.mrf.mxu2  ;;  %v1408_v33 = vadd.f32 %v2821_v49, %v1372_v20 }
 0x1b4   : > { %v1195_v59 = vadd.f32 %v1194_v44, %v1094_v27 }
 0x1b5   : > { %v1440_v4 = vmax.f32 %v1408_v33, 0.0 }
 0x1b8   : > { %1849 = vmatmul.msk.bf16.gmra.mxu2 %vm1030_vm6, %v2722_v63  ;;  %v1294_v51 = vpop.f32.mrf.mxu3 }
 0x1b9   : > { %v1373_v13 = vadd.f32 %v1294_v51, %v1195_v59 }
 0x1ba   : > { %v1097_v12 = vpop.f32.mrf.mxu1 }
 0x1bb   : > { %v1409_v60 = vadd.f32 %v2821_v49, %v1373_v13  ;;  %v1197_v42 = vpop.f32.mrf.mxu2 }
 0x1bc   : > { %v1198_v9 = vadd.f32 %v1197_v42, %v1097_v12 }
 0x1bd   : > { %v1441_v43 = vmax.f32 %v1409_v60, 0.0  ;;  %1829 = vmatmul.msk.bf16.gmra.mxu1 %vm1030_vm6, %v2736_v30 }
 0x1be   : > { %1871 = vmatmul.msk.bf16.gmra.mxu3 %vm1030_vm6, %v2726_v0 }
 0x1bf   : > { %v1472_v32 = vpack.c.bf16 %v1441_v43, %v1440_v4 }
 0x1c0   : > { %v1297_v15 = vpop.f32.mrf.mxu3 }
 0x1c1   : > { %1878 = vmatmul.msk.bf16.vlgmr.msrb.gmra.mxu0 %vm935_vm4, %v1472_v32  ;;  %v1374_v1 = vadd.f32 %v1297_v15, %v1198_v9 }
 0x1c2   : > { %v1099_v63 = vpop.f32.mrf.mxu1 }
 0x1c3   : > { %v1199_v31 = vpop.f32.mrf.mxu2  ;;  %v1410_v16 = vadd.f32 %v2821_v49, %v1374_v1 }
 0x1c4   : > { %v1200_v61 = vadd.f32 %v1199_v31, %v1099_v63 }
 0x1c5   : > { %v1442_v52 = vmax.f32 %v1410_v16, 0.0 }
 0x1c8   : > { %1850 = vmatmul.msk.bf16.gmra.mxu2 %vm1030_vm6, %v2736_v30  ;;  %v1299_v56 = vpop.f32.mrf.mxu3 }
 0x1c9   : > { %v1375_v19 = vadd.f32 %v1299_v56, %v1200_v61 }
 0x1ca   : > { %v1102_v45 = vpop.f32.mrf.mxu1 }
 0x1cb   : > { %v1411_v21 = vadd.f32 %v2821_v49, %v1375_v19  ;;  %v1202_v41 = vpop.f32.mrf.mxu2 }
 0x1cc   : > { %v1203_v10 = vadd.f32 %v1202_v41, %v1102_v45 }
 0x1cd   : > { %v1443_v8 = vmax.f32 %v1411_v21, 0.0  ;;  %1830 = vmatmul.msk.bf16.gmra.mxu1 %vm1030_vm6, %v2726_v0 }
 0x1ce   : > { %1872 = vmatmul.msk.bf16.gmra.mxu3 %vm1030_vm6, %v2762_v55 }
 0x1cf   : > { %v1473_v37 = vpack.c.bf16 %v1443_v8, %v1442_v52 }
 0x1d1   : > { %v1302_v58 = vpop.f32.mrf.mxu3  ;;  %1879 = vmatmul.msk.bf16.gmra.mxu0 %vm935_vm4, %v1473_v37 }
 0x1d2   : > { %v1104_v30 = vpop.f32.mrf.mxu1  ;;  %v1376_v18 = vadd.f32 %v1302_v58, %v1203_v10 }
 0x1d3   : > { %v1204_v17 = vpop.f32.mrf.mxu2 }
 0x1d4   : > { %v1205_v36 = vadd.f32 %v1204_v17, %v1104_v30  ;;  %v1412_v47 = vadd.f32 %v2821_v49, %v1376_v18 }
 0x1d6   : > { %v1444_v34 = vmax.f32 %v1412_v47, 0.0 }
 0x1d8   : > { %1851 = vmatmul.msk.bf16.gmra.mxu2 %vm1030_vm6, %v2726_v0 }
 0x1d9   : > { %v1304_v46 = vpop.f32.mrf.mxu3 }
 0x1da   : > { %v1377_v28 = vadd.f32 %v1304_v46, %v1205_v36  ;;  %v1107_v57 = vpop.f32.mrf.mxu1 }
 0x1db   : > { %v1207_v62 = vpop.f32.mrf.mxu2 }
 0x1dc   : > { %v1413_v53 = vadd.f32 %v2821_v49, %v1377_v28  ;;  %v1208_v5 = vadd.f32 %v1207_v62, %v1107_v57 }
 0x1dd   : > { %1831 = vmatmul.msk.bf16.gmra.mxu1 %vm1030_vm6, %v2762_v55 }
 0x1de   : > { %v1445_v25 = vmax.f32 %v1413_v53, 0.0  ;;  %1873 = vmatmul.msk.bf16.gmra.mxu3 %vm1030_vm6, %v2772_v2 }
 0x1e0   : > { %v1474_v50 = vpack.c.bf16 %v1445_v25, %v1444_v34 }
 0x1e1   : > { %v1307_v24 = vpop.f32.mrf.mxu3 }
 0x1e2   : > { %1880 = vmatmul.msk.bf16.gmra.mxu0 %vm935_vm4, %v1474_v50  ;;  %v1109_v0 = vpop.f32.mrf.mxu1  ;;  %v1378_v54 = vadd.f32 %v1307_v24, %v1208_v5 }
 0x1e3   : > { %v1209_v23 = vpop.f32.mrf.mxu2 }
 0x1e4   : > { %v1210_v7 = vadd.f32 %v1209_v23, %v1109_v0  ;;  %v1414_v48 = vadd.f32 %v2821_v49, %v1378_v54 }
 0x1e6   : > { %v1446_v35 = vmax.f32 %v1414_v48, 0.0 }
 0x1e8   : > { %1852 = vmatmul.msk.bf16.gmra.mxu2 %vm1030_vm6, %v2762_v55 }
 0x1e9   : > { %v1309_v3 = vpop.f32.mrf.mxu3 }
 0x1ea   : > { %v1379_v6 = vadd.f32 %v1309_v3, %v1210_v7  ;;  %v1112_v39 = vpop.f32.mrf.mxu1 }
 0x1eb   : > { %v1212_v14 = vpop.f32.mrf.mxu2 }
 0x1ec   : > { %v1415_v38 = vadd.f32 %v2821_v49, %v1379_v6  ;;  %v1213_v59 = vadd.f32 %v1212_v14, %v1112_v39 }
 0x1ed   : > { %1832 = vmatmul.msk.bf16.gmra.mxu1 %vm1030_vm6, %v2772_v2 }
 0x1ee   : > { %v1447_v27 = vmax.f32 %v1415_v38, 0.0  ;;  %1874 = vmatmul.msk.bf16.gmra.mxu3 %vm1030_vm6, %v2760_v26 }
 0x1f0   : > { %v1475_v40 = vpack.c.bf16 %v1447_v27, %v1446_v35 }
 0x1f1   : > { %v1312_v44 = vpop.f32.mrf.mxu3 }
 0x1f2   : > { %1881 = vmatmul.msk.bf16.gmra.mxu0 %vm935_vm4, %v1475_v40  ;;  %v1114_v55 = vpop.f32.mrf.mxu1  ;;  %v1380_v51 = vadd.f32 %v1312_v44, %v1213_v59 }
 0x1f3   : > { %v1214_v20 = vpop.f32.mrf.mxu2 }
 0x1f4   : > { %v1215_v33 = vadd.f32 %v1214_v20, %v1114_v55  ;;  %v1416_v12 = vadd.f32 %v2821_v49, %v1380_v51 }
 0x1f6   : > { %v1448_v32 = vmax.f32 %v1416_v12, 0.0 }
 0x1f8   : > { %1853 = vmatmul.msk.bf16.gmra.mxu2 %vm1030_vm6, %v2772_v2 }
 0x1f9   : > { %v1314_v13 = vpop.f32.mrf.mxu3 }
 0x1fa   : > { %v1381_v60 = vadd.f32 %v1314_v13, %v1215_v33  ;;  %v1117_v42 = vpop.f32.mrf.mxu1 }
 0x1fb   : > { %v1217_v4 = vpop.f32.mrf.mxu2 }
 0x1fc   : > { %v1417_v43 = vadd.f32 %v2821_v49, %v1381_v60  ;;  %v1218_v1 = vadd.f32 %v1217_v4, %v1117_v42  ;;  %v2893_v60 = vld [vmem:[%s3062_s6] ss:$0 sm:$0xff] }
 0x1fd   : > { %1833 = vmatmul.msk.bf16.gmra.mxu1 %vm1030_vm6, %v2760_v26 }
 0x1fe   : > { %v1449_v15 = vmax.f32 %v1417_v43, 0.0  ;;  %1875 = vmatmul.msk.bf16.gmra.mxu3 %vm1030_vm6, %v2788_v11 }
 0x200   : > { %v1476_v63 = vpack.c.bf16 %v1449_v15, %v1448_v32 }
 0x201   : > { %v1317_v9 = vpop.f32.mrf.mxu3 }
 0x202   : > { %1882 = vmatmul.msk.bf16.gmra.mxu0 %vm935_vm4, %v1476_v63  ;;  %v1119_v2 = vpop.f32.mrf.mxu1  ;;  %v1382_v61 = vadd.f32 %v1317_v9, %v1218_v1  ;;  %v2079_v9 = vld [vmem:[%s2181_s8] sm:$0xff] }
 0x203   : > { %v1219_v31 = vpop.f32.mrf.mxu2 }
 0x204   : > { %v1220_v56 = vadd.f32 %v1219_v31, %v1119_v2  ;;  %v1418_v19 = vadd.f32 %v2821_v49, %v1382_v61 }
 0x206   : > { %v1450_v8 = vmax.f32 %v1418_v19, 0.0 }
 0x208   : > { %1854 = vmatmul.msk.bf16.gmra.mxu2 %vm1030_vm6, %v2760_v26 }
 0x209   : > { %v1319_v16 = vpop.f32.mrf.mxu3 }
 0x20a   : > { %v1383_v45 = vadd.f32 %v1319_v16, %v1220_v56  ;;  %v1122_v21 = vpop.f32.mrf.mxu1 }
 0x20b   : > { %v1222_v41 = vpop.f32.mrf.mxu2 }
 0x20c   : > { %v1419_v52 = vadd.f32 %v2821_v49, %v1383_v45  ;;  %v1223_v10 = vadd.f32 %v1222_v41, %v1122_v21 }
 0x20d   : > { %1834 = vmatmul.msk.bf16.gmra.mxu1 %vm1030_vm6, %v2788_v11 }
 0x20e   : > { %v1451_v37 = vmax.f32 %v1419_v52, 0.0  ;;  %1876 = vmatmul.msk.bf16.gmra.mxu3 %vm1030_vm6, %v2798_v29  ;;  %v2080_v52 = vld [vmem:[%s2181_s8 + $0x8] sm:$0xff] }
 0x210   : > { %v1477_v58 = vpack.c.bf16 %v1451_v37, %v1450_v8 }
 0x211   : > { %v1322_v30 = vpop.f32.mrf.mxu3 }
 0x212   : > { %1883 = vmatmul.msk.bf16.gmra.mxu0 %vm935_vm4, %v1477_v58  ;;  %v1124_v26 = vpop.f32.mrf.mxu1  ;;  %v1384_v18 = vadd.f32 %v1322_v30, %v1223_v10 }
 0x213   : > { %v1224_v17 = vpop.f32.mrf.mxu2 }
 0x214   : > { %v1225_v36 = vadd.f32 %v1224_v17, %v1124_v26  ;;  %v1420_v47 = vadd.f32 %v2821_v49, %v1384_v18 }
 0x216   : > { %v1452_v34 = vmax.f32 %v1420_v47, 0.0 }
 0x218   : > { %1855 = vmatmul.msk.bf16.gmra.mxu2 %vm1030_vm6, %v2788_v11 }
 0x219   : > { %v1324_v46 = vpop.f32.mrf.mxu3 }
 0x21a   : > { %v1385_v28 = vadd.f32 %v1324_v46, %v1225_v36  ;;  %v1127_v57 = vpop.f32.mrf.mxu1 }
 0x21b   : > { %v1227_v62 = vpop.f32.mrf.mxu2 }
 0x21c   : > { %v1421_v53 = vadd.f32 %v2821_v49, %v1385_v28  ;;  %v1228_v23 = vadd.f32 %v1227_v62, %v1127_v57  ;;  %v2081_v62 = vld [vmem:[%s2181_s8 + $0x10] sm:$0xff] }
 0x21d   : > { %1835 = vmatmul.msk.bf16.gmra.mxu1 %vm1030_vm6, %v2798_v29 }
 0x21e   : > { %v1453_v25 = vmax.f32 %v1421_v53, 0.0  ;;  %1877 = vmatmul.msk.bf16.gmra.mxu3 %vm1030_vm6, %v2565_v22 }
 0x220   : > { %v1478_v50 = vpack.c.bf16 %v1453_v25, %v1452_v34 }
 0x221   : > { %v1327_v24 = vpop.f32.mrf.mxu3 }
 0x222   : > { %1884 = vmatmul.msk.bf16.gmra.mxu0 %vm935_vm4, %v1478_v50  ;;  %v1129_v11 = vpop.f32.mrf.mxu1  ;;  %v1386_v5 = vadd.f32 %v1327_v24, %v1228_v23 }
 0x223   : > { %v1229_v0 = vpop.f32.mrf.mxu2 }
 0x224   : > { %v1230_v54 = vadd.f32 %v1229_v0, %v1129_v11  ;;  %v1422_v3 = vadd.f32 %v2821_v49, %v1386_v5 }
 0x226   : > { %v1454_v14 = vmax.f32 %v1422_v3, 0.0 }
 0x229   : > { %v1329_v7 = vpop.f32.mrf.mxu3 }
 0x22a   : > { %v1387_v48 = vadd.f32 %v1329_v7, %v1230_v54  ;;  %v1132_v6 = vpop.f32.mrf.mxu1  ;;  %v2082_v7 = vld [vmem:[%s2181_s8 + $0x18] sm:$0xff] }
 0x22b   : > { %v1232_v29 = vpop.f32.mrf.mxu2 }
 0x22c   : > { %v1423_v39 = vadd.f32 %v2821_v49, %v1387_v48  ;;  %v1233_v44 = vadd.f32 %v1232_v29, %v1132_v6 }
 0x22e   : > { %v1455_v38 = vmax.f32 %v1423_v39, 0.0 }
 0x230   : > { %v1479_v22 = vpack.c.bf16 %v1455_v38, %v1454_v14 }
 0x231   : > { %v1332_v35 = vpop.f32.mrf.mxu3 }
 0x232   : > { %1885 = vmatmul.msk.bf16.gmra.mxu0 %vm935_vm4, %v1479_v22  ;;  %v1134_v27 = vpop.f32.mrf.mxu1  ;;  %v1388_v55 = vadd.f32 %v1332_v35, %v1233_v44 }
 0x233   : > { %v1234_v40 = vpop.f32.mrf.mxu2 }
 0x234   : > { %v1235_v20 = vadd.f32 %v1234_v40, %v1134_v27  ;;  %v1424_v51 = vadd.f32 %v2821_v49, %v1388_v55 }
 0x236   : > { %v1456_v4 = vmax.f32 %v1424_v51, 0.0 }
 0x239   : > { %v1334_v59 = vpop.f32.mrf.mxu3 }
 0x23a   : > { %v1389_v33 = vadd.f32 %v1334_v59, %v1235_v20  ;;  %v1137_v13 = vpop.f32.mrf.mxu1  ;;  %v2083_v59 = vld [vmem:[%s2181_s8 + $0x20] sm:$0xff] }
 0x23b   : > { %v1237_v12 = vpop.f32.mrf.mxu2 }
 0x23c   : > { %v1425_v42 = vadd.f32 %v2821_v49, %v1389_v33  ;;  %v1238_v16 = vadd.f32 %v1237_v12, %v1137_v13 }
 0x23e   : > { %v1457_v43 = vmax.f32 %v1425_v42, 0.0  ;;  %v1554_v32 = vpop.f32.mrf.mxu0 }
 0x23f   : > { %v1555_v15 = vadd.f32 %v2893_v60, %v1554_v32 }
 0x240   : > { %v1480_v63 = vpack.c.bf16 %v1457_v43, %v1456_v4 }
 0x241   : > { %v1634_v2 = vadd.f32 %v2079_v9, %v1555_v15  ;;  %v1337_v31 = vpop.f32.mrf.mxu3 }
 0x242   : > { %1886 = vmatmul.msk.bf16.gmra.mxu0 %vm935_vm4, %v1480_v63  ;;  %v1139_v1 = vpop.f32.mrf.mxu1  ;;  %v1390_v19 = vadd.f32 %v1337_v31, %v1238_v16 }
 0x243   : > { %v1666_v61 = vmax.f32 %v1634_v2, 0.0  ;;  %v1239_v56 = vpop.f32.mrf.mxu2  ;;  %v2084_v2 = vld [vmem:[%s2181_s8 + $0x28] sm:$0xff] }
 0x244   : > { %v1240_v41 = vadd.f32 %v1239_v56, %v1139_v1  ;;  %v1426_v58 = vadd.f32 %v2821_v49, %v1390_v19 }
 0x245   : > { %1698 = vst.msk [vmem:[%s2903_s14] sm:$0xff] %vm340_vm0, %v1666_v61 }
 0x246   : > { %v1556_v45 = vpop.f32.mrf.mxu0  ;;  %v1458_v36 = vmax.f32 %v1426_v58, 0.0  ;;  %v2085_v58 = vld [vmem:[%s2181_s8 + $0x30] sm:$0xff] }
 0x247   : > { %v1557_v21 = vadd.f32 %v2893_v60, %v1556_v45 }
 0x249   : > { %v1635_v8 = vadd.f32 %v2080_v52, %v1557_v21  ;;  %v1339_v37 = vpop.f32.mrf.mxu3 }
 0x24a   : > { %v1391_v30 = vadd.f32 %v1339_v37, %v1240_v41  ;;  %v1142_v26 = vpop.f32.mrf.mxu1 }
 0x24b   : > { %v1667_v17 = vmax.f32 %v1635_v8, 0.0  ;;  %v1242_v10 = vpop.f32.mrf.mxu2 }
 0x24c   : > { %v1427_v18 = vadd.f32 %v2821_v49, %v1391_v30  ;;  %v1243_v11 = vadd.f32 %v1242_v10, %v1142_v26 }
 0x24d   : > { %1699 = vst.msk [vmem:[%s2903_s14 + $0x8] sm:$0xff] %vm340_vm0, %v1667_v17 }
 0x24e   : > { %v1459_v46 = vmax.f32 %v1427_v18, 0.0  ;;  %v1559_v47 = vpop.f32.mrf.mxu0 }
 0x24f   : > { %v1560_v28 = vadd.f32 %v2893_v60, %v1559_v47 }
 0x250   : > { %v1481_v57 = vpack.c.bf16 %v1459_v46, %v1458_v36 }
 0x251   : > { %v1636_v53 = vadd.f32 %v2081_v62, %v1560_v28  ;;  %v1342_v34 = vpop.f32.mrf.mxu3 }
 0x252   : > { %1887 = vmatmul.msk.bf16.gmra.mxu0 %vm935_vm4, %v1481_v57  ;;  %v1144_v25 = vpop.f32.mrf.mxu1  ;;  %v1392_v0 = vadd.f32 %v1342_v34, %v1243_v11 }
 0x253   : > { %v1668_v50 = vmax.f32 %v1636_v53, 0.0  ;;  %v1244_v24 = vpop.f32.mrf.mxu2  ;;  %v2086_v53 = vld [vmem:[%s2181_s8 + $0x38] sm:$0xff] }
 0x254   : > { %v1245_v54 = vadd.f32 %v1244_v24, %v1144_v25  ;;  %v1428_v6 = vadd.f32 %v2821_v49, %v1392_v0 }
 0x255   : > { %1700 = vst.msk [vmem:[%s2903_s14 + $0x10] sm:$0xff] %vm340_vm0, %v1668_v50 }
 0x256   : > { %v1561_v23 = vpop.f32.mrf.mxu0  ;;  %v1460_v35 = vmax.f32 %v1428_v6, 0.0  ;;  %v2087_v6 = vld [vmem:[%s2181_s8 + $0x40] sm:$0xff] }
 0x257   : > { %v1562_v5 = vadd.f32 %v2893_v60, %v1561_v23 }
 0x259   : > { %v1637_v3 = vadd.f32 %v2082_v7, %v1562_v5  ;;  %v1344_v48 = vpop.f32.mrf.mxu3 }
 0x25a   : > { %v1393_v29 = vadd.f32 %v1344_v48, %v1245_v54  ;;  %v1147_v39 = vpop.f32.mrf.mxu1 }
 0x25b   : > { %v1669_v14 = vmax.f32 %v1637_v3, 0.0  ;;  %v1247_v38 = vpop.f32.mrf.mxu2 }
 0x25c   : > { %v1429_v22 = vadd.f32 %v2821_v49, %v1393_v29  ;;  %v1248_v12 = vadd.f32 %v1247_v38, %v1147_v39 }
 0x25d   : > { %1701 = vst.msk [vmem:[%s2903_s14 + $0x18] sm:$0xff] %vm340_vm0, %v1669_v14 }
 0x25e   : > { %v1461_v27 = vmax.f32 %v1429_v22, 0.0 }
 0x25f   : > { %v1564_v40 = vpop.f32.mrf.mxu0 }
 0x260   : > { %v1482_v44 = vpack.c.bf16 %v1461_v27, %v1460_v35  ;;  %v1565_v55 = vadd.f32 %v2893_v60, %v1564_v40 }
 0x261   : > { %v1347_v20 = vpop.f32.mrf.mxu3 }
 0x262   : > { %v1638_v51 = vadd.f32 %v2083_v59, %v1565_v55  ;;  %1888 = vmatmul.msk.bf16.gmra.mxu0 %vm935_vm4, %v1482_v44  ;;  %v1149_v33 = vpop.f32.mrf.mxu1  ;;  %v1394_v4 = vadd.f32 %v1347_v20, %v1248_v12  ;;  %v2088_v59 = vld [vmem:[%s2181_s8 + $0x48] sm:$0xff] }
 0x263   : > { %v1249_v13 = vpop.f32.mrf.mxu2 }
 0x264   : > { %v1670_v42 = vmax.f32 %v1638_v51, 0.0  ;;  %v1250_v32 = vadd.f32 %v1249_v13, %v1149_v33  ;;  %v1430_v9 = vadd.f32 %v2821_v49, %v1394_v4 }
 0x266   : > { %1702 = vst.msk [vmem:[%s2903_s14 + $0x20] sm:$0xff] %vm340_vm0, %v1670_v42  ;;  %v1462_v45 = vmax.f32 %v1430_v9, 0.0 }
 0x267   : > { %v1566_v43 = vpop.f32.mrf.mxu0 }
 0x268   : > { %v1567_v15 = vadd.f32 %v2893_v60, %v1566_v43 }
 0x269   : > { %v1349_v63 = vpop.f32.mrf.mxu3 }
 0x26a   : > { %v1639_v31 = vadd.f32 %v2084_v2, %v1567_v15  ;;  %v1395_v1 = vadd.f32 %v1349_v63, %v1250_v32  ;;  %v1152_v61 = vpop.f32.mrf.mxu1 }
 0x26b   : > { %v1252_v56 = vpop.f32.mrf.mxu2 }
 0x26c   : > { %v1671_v16 = vmax.f32 %v1639_v31, 0.0  ;;  %v1431_v19 = vadd.f32 %v2821_v49, %v1395_v1  ;;  %v1253_v10 = vadd.f32 %v1252_v56, %v1152_v61  ;;  %v2089_v31 = vld [vmem:[%s2181_s8 + $0x50] sm:$0xff] }
 0x26e   : > { %1703 = vst.msk [vmem:[%s2903_s14 + $0x28] sm:$0xff] %vm340_vm0, %v1671_v16  ;;  %v1463_v21 = vmax.f32 %v1431_v19, 0.0 }
 0x26f   : > { %v1569_v41 = vpop.f32.mrf.mxu0 }
 0x270   : > { %v1483_v52 = vpack.c.bf16 %v1463_v21, %v1462_v45  ;;  %v1570_v8 = vadd.f32 %v2893_v60, %v1569_v41 }
 0x271   : > { %v1352_v37 = vpop.f32.mrf.mxu3 }
 0x272   : > { %v1640_v30 = vadd.f32 %v2085_v58, %v1570_v8  ;;  %1889 = vmatmul.msk.bf16.gmra.mxu0 %vm935_vm4, %v1483_v52  ;;  %v1154_v26 = vpop.f32.mrf.mxu1  ;;  %v1396_v36 = vadd.f32 %v1352_v37, %v1253_v10  ;;  %v2090_v58 = vld [vmem:[%s2181_s8 + $0x58] sm:$0xff] }
 0x273   : > { %v1254_v17 = vpop.f32.mrf.mxu2 }
 0x274   : > { %v1672_v18 = vmax.f32 %v1640_v30, 0.0  ;;  %v1255_v47 = vadd.f32 %v1254_v17, %v1154_v26  ;;  %v1432_v62 = vadd.f32 %v2821_v49, %v1396_v36 }
 0x276   : > { %1704 = vst.msk [vmem:[%s2903_s14 + $0x30] sm:$0xff] %vm340_vm0, %v1672_v18  ;;  %v1464_v23 = vmax.f32 %v1432_v62, 0.0 }
 0x277   : > { %v1571_v46 = vpop.f32.mrf.mxu0 }
 0x278   : > { %v1572_v28 = vadd.f32 %v2893_v60, %v1571_v46 }
 0x279   : > { %v1354_v57 = vpop.f32.mrf.mxu3 }
 0x27a   : > { %v1641_v34 = vadd.f32 %v2086_v53, %v1572_v28  ;;  %v1397_v25 = vadd.f32 %v1354_v57, %v1255_v47  ;;  %v1157_v50 = vpop.f32.mrf.mxu1 }
 0x27b   : > { %v1257_v24 = vpop.f32.mrf.mxu2 }
 0x27c   : > { %v1673_v11 = vmax.f32 %v1641_v34, 0.0  ;;  %v1433_v0 = vadd.f32 %v2821_v49, %v1397_v25  ;;  %v1258_v38 = vadd.f32 %v1257_v24, %v1157_v50  ;;  %v2091_v34 = vld [vmem:[%s2181_s8 + $0x60] sm:$0xff] }
 0x27e   : > { %1705 = vst.msk [vmem:[%s2903_s14 + $0x38] sm:$0xff] %vm340_vm0, %v1673_v11  ;;  %v1465_v5 = vmax.f32 %v1433_v0, 0.0 }
 0x27f   : > { %v1574_v54 = vpop.f32.mrf.mxu0 }
 0x280   : > { %v1484_v7 = vpack.c.bf16 %v1465_v5, %v1464_v23  ;;  %v1575_v3 = vadd.f32 %v2893_v60, %v1574_v54 }
 0x281   : > { %v1357_v48 = vpop.f32.mrf.mxu3 }
 0x282   : > { %v1642_v29 = vadd.f32 %v2087_v6, %v1575_v3  ;;  %1890 = vmatmul.msk.bf16.gmra.mxu0 %vm935_vm4, %v1484_v7  ;;  %v1159_v39 = vpop.f32.mrf.mxu1  ;;  %v1398_v35 = vadd.f32 %v1357_v48, %v1258_v38  ;;  %v2092_v6 = vld [vmem:[%s2181_s8 + $0x68] sm:$0xff] }
 0x283   : > { %v1259_v14 = vpop.f32.mrf.mxu2 }
 0x284   : > { %v1674_v22 = vmax.f32 %v1642_v29, 0.0  ;;  %v1260_v40 = vadd.f32 %v1259_v14, %v1159_v39  ;;  %v1434_v20 = vadd.f32 %v2821_v49, %v1398_v35 }
 0x286   : > { %1706 = vst.msk [vmem:[%s2903_s14 + $0x40] sm:$0xff] %vm340_vm0, %v1674_v22  ;;  %v1466_v43 = vmax.f32 %v1434_v20, 0.0 }
 0x287   : > { %v1576_v27 = vpop.f32.mrf.mxu0 }
 0x288   : > { %v1577_v44 = vadd.f32 %v2893_v60, %v1576_v27 }
 0x289   : > { %v1359_v55 = vpop.f32.mrf.mxu3 }
 0x28a   : > { %v1643_v51 = vadd.f32 %v2088_v59, %v1577_v44  ;;  %v1399_v33 = vadd.f32 %v1359_v55, %v1260_v40  ;;  %v1162_v13 = vpop.f32.mrf.mxu1  ;;  %v2093_v55 = vld [vmem:[%s2181_s8 + $0x70] sm:$0xff] }
 0x28b   : > { %v1262_v12 = vpop.f32.mrf.mxu2 }
 0x28c   : > { %v1675_v42 = vmax.f32 %v1643_v51, 0.0  ;;  %v1435_v4 = vadd.f32 %v2821_v49, %v1399_v33  ;;  %v1263_v16 = vadd.f32 %v1262_v12, %v1162_v13  ;;  %v2094_v33 = vld [vmem:[%s2181_s8 + $0x78] sm:$0xff] }
 0x28e   : > { %1707 = vst.msk [vmem:[%s2903_s14 + $0x48] sm:$0xff] %vm340_vm0, %v1675_v42  ;;  %v1467_v32 = vmax.f32 %v1435_v4, 0.0 }
 0x28f   : > { %v1579_v15 = vpop.f32.mrf.mxu0 }
 0x290   : > { %v1485_v63 = vpack.c.bf16 %v1467_v32, %v1466_v43  ;;  %v1580_v9 = vadd.f32 %v2893_v60, %v1579_v15  ;;  %v2095_v43 = vld [vmem:[%s2181_s8 + $0x80] sm:$0xff] }
 0x291   : > { %v1362_v2 = vpop.f32.mrf.mxu3 }
 0x292   : > { %v1644_v1 = vadd.f32 %v2089_v31, %v1580_v9  ;;  %1891 = vmatmul.msk.bf16.gmra.mxu0 %vm935_vm4, %v1485_v63  ;;  %v1164_v61 = vpop.f32.mrf.mxu1  ;;  %v1400_v45 = vadd.f32 %v1362_v2, %v1263_v16  ;;  %v2096_v2 = vld [vmem:[%s2181_s8 + $0x88] sm:$0xff]  ;;  %v2097_v16 = vld [vmem:[%s2181_s8 + $0x90] sm:$0xff] }
 0x293   : > { %v1264_v56 = vpop.f32.mrf.mxu2 }
 0x294   : > { %v1676_v19 = vmax.f32 %v1644_v1, 0.0  ;;  %v1265_v41 = vadd.f32 %v1264_v56, %v1164_v61  ;;  %v1436_v37 = vadd.f32 %v2821_v49, %v1400_v45 }
 0x296   : > { %1708 = vst.msk [vmem:[%s2903_s14 + $0x50] sm:$0xff] %vm340_vm0, %v1676_v19  ;;  %v1468_v46 = vmax.f32 %v1436_v37, 0.0 }
 0x297   : > { %v1581_v21 = vpop.f32.mrf.mxu0 }
 0x298   : > { %v1582_v52 = vadd.f32 %v2893_v60, %v1581_v21 }
 0x299   : > { %v1364_v8 = vpop.f32.mrf.mxu3 }
 0x29a   : > { %v1645_v30 = vadd.f32 %v2090_v58, %v1582_v52  ;;  %v1401_v26 = vadd.f32 %v1364_v8, %v1265_v41  ;;  %v1167_v17 = vpop.f32.mrf.mxu1  ;;  %v2098_v52 = vld [vmem:[%s2181_s8 + $0x98] sm:$0xff] }
 0x29b   : > { %v1267_v10 = vpop.f32.mrf.mxu2 }
 0x29c   : > { %v1677_v18 = vmax.f32 %v1645_v30, 0.0  ;;  %v1437_v36 = vadd.f32 %v2821_v49, %v1401_v26  ;;  %v1268_v50 = vadd.f32 %v1267_v10, %v1167_v17  ;;  %v2099_v26 = vld [vmem:[%s2181_s8 + $0xa0] sm:$0xff] }
 0x29e   : > { %1709 = vst.msk [vmem:[%s2903_s14 + $0x58] sm:$0xff] %vm340_vm0, %v1677_v18  ;;  %v1469_v47 = vmax.f32 %v1437_v36, 0.0 }
 0x29f   : > { %v1584_v28 = vpop.f32.mrf.mxu0 }
 0x2a0   : > { %v1486_v57 = vpack.c.bf16 %v1469_v47, %v1468_v46  ;;  %v1585_v62 = vadd.f32 %v2893_v60, %v1584_v28  ;;  %v2100_v46 = vld [vmem:[%s2181_s8 + $0xa8] sm:$0xff] }
 0x2a1   : > { %v1367_v53 = vpop.f32.mrf.mxu3 }
 0x2a2   : > { %v1646_v25 = vadd.f32 %v2091_v34, %v1585_v62  ;;  %1892 = vmatmul.msk.bf16.gmra.mxu0 %vm935_vm4, %v1486_v57  ;;  %v1169_v11 = vpop.f32.mrf.mxu1  ;;  %v1402_v23 = vadd.f32 %v1367_v53, %v1268_v50  ;;  %v2101_v53 = vld [vmem:[%s2181_s8 + $0xb0] sm:$0xff] }
 0x2a3   : > { %v1269_v0 = vpop.f32.mrf.mxu2 }
 0x2a4   : > { %v1678_v24 = vmax.f32 %v1646_v25, 0.0  ;;  %v1270_v54 = vadd.f32 %v1269_v0, %v1169_v11  ;;  %v1438_v48 = vadd.f32 %v2821_v49, %v1402_v23  ;;  %v2102_v11 = vld [vmem:[%s2181_s8 + $0xb8] sm:$0xff] }
 0x2a6   : > { %1710 = vst.msk [vmem:[%s2903_s14 + $0x60] sm:$0xff] %vm340_vm0, %v1678_v24  ;;  %v1470_v22 = vmax.f32 %v1438_v48, 0.0 }
 0x2a7   : > { %v1586_v5 = vpop.f32.mrf.mxu0 }
 0x2a8   : > { %v1587_v7 = vadd.f32 %v2893_v60, %v1586_v5 }
 0x2a9   : > { %v1369_v3 = vpop.f32.mrf.mxu3 }
 0x2aa   : > { %v1647_v29 = vadd.f32 %v2092_v6, %v1587_v7  ;;  %v1403_v39 = vadd.f32 %v1369_v3, %v1270_v54  ;;  %v2103_v7 = vld [vmem:[%s2181_s8 + $0xc0] sm:$0xff] }
 0x2ac   : > { %v1679_v14 = vmax.f32 %v1647_v29, 0.0  ;;  %v1439_v38 = vadd.f32 %v2821_v49, %v1403_v39  ;;  %v2104_v39 = vld [vmem:[%s2181_s8 + $0xc8] sm:$0xff] }
 0x2ae   : > { %1711 = vst.msk [vmem:[%s2903_s14 + $0x68] sm:$0xff] %vm340_vm0, %v1679_v14  ;;  %v1471_v35 = vmax.f32 %v1439_v38, 0.0 }
 0x2af   : > { %v1589_v27 = vpop.f32.mrf.mxu0 }
 0x2b0   : > { %v1487_v40 = vpack.c.bf16 %v1471_v35, %v1470_v22  ;;  %v1590_v44 = vadd.f32 %v2893_v60, %v1589_v27  ;;  %v2105_v27 = vld [vmem:[%s2181_s8 + $0xd0] sm:$0xff] }
 0x2b2   : > { %v1648_v20 = vadd.f32 %v2093_v55, %v1590_v44  ;;  %1893 = vmatmul.msk.bf16.gmra.mxu0 %vm935_vm4, %v1487_v40 }
 0x2b4   : > { %v1680_v59 = vmax.f32 %v1648_v20, 0.0 }
 0x2b6   : > { %1712 = vst.msk [vmem:[%s2903_s14 + $0x70] sm:$0xff] %vm340_vm0, %v1680_v59  ;;  %v2106_v59 = vld [vmem:[%s2181_s8 + $0xd8] sm:$0xff] }
 0x2b7   : > { %v1591_v49 = vpop.f32.mrf.mxu0 }
 0x2b8   : > { %v1592_v51 = vadd.f32 %v2893_v60, %v1591_v49 }
 0x2ba   : > { %v1649_v13 = vadd.f32 %v2094_v33, %v1592_v51 }
 0x2bc   : > { %v1681_v12 = vmax.f32 %v1649_v13, 0.0 }
 0x2be   : > { %1713 = vst.msk [vmem:[%s2903_s14 + $0x78] sm:$0xff] %vm340_vm0, %v1681_v12  ;;  %v2107_v12 = vld [vmem:[%s2181_s8 + $0xe0] sm:$0xff] }
 0x2bf   : > { %v1594_v42 = vpop.f32.mrf.mxu0 }
 0x2c0   : > { %v1595_v4 = vadd.f32 %v2893_v60, %v1594_v42 }
 0x2c2   : > { %v1650_v32 = vadd.f32 %v2095_v43, %v1595_v4 }
 0x2c4   : > { %v1682_v15 = vmax.f32 %v1650_v32, 0.0 }
 0x2c6   : > { %1714 = vst.msk [vmem:[%s2903_s14 + $0x80] sm:$0xff] %vm340_vm0, %v1682_v15  ;;  %v2108_v15 = vld [vmem:[%s2181_s8 + $0xe8] sm:$0xff] }
 0x2c7   : > { %v1596_v63 = vpop.f32.mrf.mxu0 }
 0x2c8   : > { %v1597_v9 = vadd.f32 %v2893_v60, %v1596_v63 }
 0x2ca   : > { %v1651_v31 = vadd.f32 %v2096_v2, %v1597_v9 }
 0x2cc   : > { %v1683_v1 = vmax.f32 %v1651_v31, 0.0 }
 0x2ce   : > { %1715 = vst.msk [vmem:[%s2903_s14 + $0x88] sm:$0xff] %vm340_vm0, %v1683_v1  ;;  %v2109_v1 = vld [vmem:[%s2181_s8 + $0xf0] sm:$0xff] }
 0x2cf   : > { %v1599_v61 = vpop.f32.mrf.mxu0 }
 0x2d0   : > { %v1600_v56 = vadd.f32 %v2893_v60, %v1599_v61 }
 0x2d2   : > { %v1652_v19 = vadd.f32 %v2097_v16, %v1600_v56 }
 0x2d4   : > { %v1684_v45 = vmax.f32 %v1652_v19, 0.0 }
 0x2d6   : > { %1716 = vst.msk [vmem:[%s2903_s14 + $0x90] sm:$0xff] %vm340_vm0, %v1684_v45  ;;  %v2110_v45 = vld [vmem:[%s2181_s8 + $0xf8] sm:$0xff] }
 0x2d7   : > { %v1601_v21 = vpop.f32.mrf.mxu0 }
 0x2d8   : > { %v1602_v41 = vadd.f32 %v2893_v60, %v1601_v21 }
 0x2da   : > { %v1653_v8 = vadd.f32 %v2098_v52, %v1602_v41 }
 0x2dc   : > { %v1685_v37 = vmax.f32 %v1653_v8, 0.0 }
 0x2de   : > { %1717 = vst.msk [vmem:[%s2903_s14 + $0x98] sm:$0xff] %vm340_vm0, %v1685_v37 }
 0x2df   : > { %v1604_v58 = vpop.f32.mrf.mxu0 }
 0x2e0   : > { %v1605_v30 = vadd.f32 %v2893_v60, %v1604_v58 }
 0x2e2   : > { %v1654_v17 = vadd.f32 %v2099_v26, %v1605_v30 }
 0x2e4   : > { %v1686_v10 = vmax.f32 %v1654_v17, 0.0 }
 0x2e6   : > { %1718 = vst.msk [vmem:[%s2903_s14 + $0xa0] sm:$0xff] %vm340_vm0, %v1686_v10 }
 0x2e7   : > { %v1606_v18 = vpop.f32.mrf.mxu0 }
 0x2e8   : > { %v1607_v36 = vadd.f32 %v2893_v60, %v1606_v18 }
 0x2ea   : > { %v1655_v47 = vadd.f32 %v2100_v46, %v1607_v36 }
 0x2ec   : > { %v1687_v28 = vmax.f32 %v1655_v47, 0.0 }
 0x2ee   : > { %1719 = vst.msk [vmem:[%s2903_s14 + $0xa8] sm:$0xff] %vm340_vm0, %v1687_v28 }
 0x2ef   : > { %v1609_v57 = vpop.f32.mrf.mxu0 }
 0x2f0   : > { %v1610_v62 = vadd.f32 %v2893_v60, %v1609_v57 }
 0x2f2   : > { %v1656_v34 = vadd.f32 %v2101_v53, %v1610_v62 }
 0x2f4   : > { %v1688_v25 = vmax.f32 %v1656_v34, 0.0 }
 0x2f6   : > { %1720 = vst.msk [vmem:[%s2903_s14 + $0xb0] sm:$0xff] %vm340_vm0, %v1688_v25 }
 0x2f7   : > { %v1611_v50 = vpop.f32.mrf.mxu0 }
 0x2f8   : > { %v1612_v24 = vadd.f32 %v2893_v60, %v1611_v50 }
 0x2fa   : > { %v1657_v0 = vadd.f32 %v2102_v11, %v1612_v24 }
 0x2fc   : > { %v1689_v23 = vmax.f32 %v1657_v0, 0.0 }
 0x2fe   : > { %1721 = vst.msk [vmem:[%s2903_s14 + $0xb8] sm:$0xff] %vm340_vm0, %v1689_v23 }
 0x2ff   : > { %v1614_v5 = vpop.f32.mrf.mxu0 }
 0x300   : > { %v1615_v54 = vadd.f32 %v2893_v60, %v1614_v5 }
 0x302   : > { %v1658_v3 = vadd.f32 %v2103_v7, %v1615_v54 }
 0x304   : > { %v1690_v48 = vmax.f32 %v1658_v3, 0.0 }
 0x306   : > { %1722 = vst.msk [vmem:[%s2903_s14 + $0xc0] sm:$0xff] %vm340_vm0, %v1690_v48 }
 0x307   : > { %v1616_v6 = vpop.f32.mrf.mxu0 }
 0x308   : > { %v1617_v29 = vadd.f32 %v2893_v60, %v1616_v6 }
 0x30a   : > { %v1659_v14 = vadd.f32 %v2104_v39, %v1617_v29 }
 0x30c   : > { %v1691_v38 = vmax.f32 %v1659_v14, 0.0 }
 0x30e   : > { %1723 = vst.msk [vmem:[%s2903_s14 + $0xc8] sm:$0xff] %vm340_vm0, %v1691_v38 }
 0x30f   : > { %v1619_v22 = vpop.f32.mrf.mxu0 }
 0x310   : > { %v1620_v35 = vadd.f32 %v2893_v60, %v1619_v22 }
 0x312   : > { %v1660_v40 = vadd.f32 %v2105_v27, %v1620_v35 }
 0x314   : > { %v1692_v44 = vmax.f32 %v1660_v40, 0.0 }
 0x316   : > { %1724 = vst.msk [vmem:[%s2903_s14 + $0xd0] sm:$0xff] %vm340_vm0, %v1692_v44 }
 0x317   : > { %v1621_v55 = vpop.f32.mrf.mxu0 }
 0x318   : > { %v1622_v20 = vadd.f32 %v2893_v60, %v1621_v55 }
 0x31a   : > { %v1661_v49 = vadd.f32 %v2106_v59, %v1622_v20 }
 0x31c   : > { %v1693_v51 = vmax.f32 %v1661_v49, 0.0 }
 0x31e   : > { %1725 = vst.msk [vmem:[%s2903_s14 + $0xd8] sm:$0xff] %vm340_vm0, %v1693_v51 }
 0x31f   : > { %v1624_v33 = vpop.f32.mrf.mxu0 }
 0x320   : > { %v1625_v13 = vadd.f32 %v2893_v60, %v1624_v33 }
 0x322   : > { %v1662_v42 = vadd.f32 %v2107_v12, %v1625_v13 }
 0x324   : > { %v1694_v4 = vmax.f32 %v1662_v42, 0.0 }
 0x326   : > { %1726 = vst.msk [vmem:[%s2903_s14 + $0xe0] sm:$0xff] %vm340_vm0, %v1694_v4 }
 0x327   : > { %v1626_v43 = vpop.f32.mrf.mxu0 }
 0x328   : > { %v1627_v32 = vadd.f32 %v2893_v60, %v1626_v43 }
 0x32a   : > { %v1663_v63 = vadd.f32 %v2108_v15, %v1627_v32 }
 0x32c   : > { %v1695_v9 = vmax.f32 %v1663_v63, 0.0 }
 0x32e   : > { %1727 = vst.msk [vmem:[%s2903_s14 + $0xe8] sm:$0xff] %vm340_vm0, %v1695_v9 }
 0x32f   : > { %v1629_v2 = vpop.f32.mrf.mxu0 }
 0x330   : > { %v1630_v31 = vadd.f32 %v2893_v60, %v1629_v2 }
 0x332   : > { %v1664_v61 = vadd.f32 %v2109_v1, %v1630_v31 }
 0x334   : > { %v1696_v56 = vmax.f32 %v1664_v61, 0.0 }
 0x336   : > { %1728 = vst.msk [vmem:[%s2903_s14 + $0xf0] sm:$0xff] %vm340_vm0, %v1696_v56 }
 0x337   : > { %v1631_v16 = vpop.f32.mrf.mxu0 }
 0x338   : > { %v1632_v19 = vadd.f32 %v2893_v60, %v1631_v16 }
 0x33a   : > { %v1665_v21 = vadd.f32 %v2110_v45, %v1632_v19 }
 0x33c   : > { %v1697_v41 = vmax.f32 %v1665_v21, 0.0 }
 0x33e   : > { %1729 = vst.msk [vmem:[%s2903_s14 + $0xf8] sm:$0xff] %vm340_vm0, %v1697_v41 }
 0x33f PF: > { %s17_s24 = sadd.s32 1, %s2117_s24  }
 0x340   : > { %p14_p4 = scmp.ge.s32.totalorder %s17_s24, 4  }
 0x342   :  { %16 = sbr.rel (!%p14_p4) target bundleno = 1 (0x1), region = 80 }

</bundles_post_ra>
